<compile_context>
chip_gen: v6e
topology: v6e:2x2x1
jax: 0.10.0
libtpu: 0.0.40
codegen_flags: <defaults>
</compile_context>

<pallas_src>
import jax
import jax.numpy as jnp
import numpy as np
from jax.experimental import pallas as pl
from jax.experimental.pallas import tpu as pltpu

NEG_BIG = -1e30       # stands in for -inf in the masked per-tile row max
LOGIT_CLAMP = 40.0    # floor of (running max - global max); keeps exp(-m) finite


def _round_up(x, m):
    return (x + m - 1) // m * m


def _attentive_gru1_kernel(
    start_ref,    # SMEM (nVt,) first edge-tile index per V tile   (prefetch)
    ntile_ref,    # SMEM (nVt,) number of edge tiles per V tile    (prefetch)
    dst_ref,      # (1, TE)   int32 edge destinations (dst-sorted, pad = Vp)
    logit_ref,    # (1, TE)   edge logits shifted by -global_max (<= 0)
    efeat_ref,    # (TE, Fe)  edge features
    nfeat_ref,    # (TV, G)   node features / GRU hidden state, lane-padded
    We_ref,       # (Fe, Hp)  edge_transform weight, lane-padded
    be_ref,       # (1, Hp)
    Wgc_ref,      # (Hp, 4G)  context-side GRU weights, 128-aligned gate blocks
    Wgh_ref,      # (G, 4G)   hidden-side GRU weights
    bg_ref,       # (1, 4G)
    out_ref,      # (TV, G)   lane-dense output
    m_acc,        # (TV, 1)   running max          (scratch)
    d_acc,        # (TV, 1)   running denominator  (scratch)
    c_acc,        # (TV, Hp)  running weighted sum (scratch)
):
    iv = pl.program_id(0)
    ie = pl.program_id(1)
    tv = nfeat_ref.shape[0]

    @pl.when(ie == 0)
    def _init():
        m_acc[...] = jnp.full_like(m_acc, -LOGIT_CLAMP)
        d_acc[...] = jnp.zeros_like(d_acc)
        c_acc[...] = jnp.zeros_like(c_acc)

    # Only the edge tiles that actually hold this V tile's incident edges.
    @pl.when(ie < ntile_ref[iv])
    def _accumulate():
        # edge_transform: Dropout (eval-mode identity) + Linear (He padded to Hp)
        t = jnp.dot(efeat_ref[...], We_ref[...],
                    preferred_element_type=jnp.float32) + be_ref[...]    # (TE, Hp)

        # incidence mask from destination ids: (tv,1) iota vs (1,te) dst broadcast
        node_col = iv * tv + jax.lax.broadcasted_iota(jnp.int32, (tv, 1), 0)
        incident = dst_ref[...] == node_col                              # (TV, TE)

        logit = logit_ref[...]                                           # (1, TE)
        masked = jnp.where(incident, logit, NEG_BIG)                     # (TV, TE)

        # online softmax; rank-1 factorized numerator: tv+te exps, not tv*te
        m_old = m_acc[...]
        m_new = jnp.maximum(m_old, jnp.max(masked, axis=1, keepdims=True))
        alpha = jnp.exp(m_old - m_new)                                   # (TV, 1)
        q = jnp.exp(logit)                                               # (1, TE)
        r = jnp.exp(-m_new)                                              # (TV, 1) <= e^40
        p = jnp.where(incident, q * r, 0.0)                              # (TV, TE)

        d_acc[...] = alpha * d_acc[...] + jnp.sum(p, axis=1, keepdims=True)
        c_acc[...] = alpha * c_acc[...] + jnp.dot(
            p, t, preferred_element_type=jnp.float32)
        m_acc[...] = m_new

    # ---- finalize: normalize, ELU, GRUCell (two matmuls), ReLU --------------
    @pl.when(ie == pl.num_programs(1) - 1)
    def _finalize():
        h = nfeat_ref[...]                                               # (TV, G)
        gw = h.shape[1]                                                  # gate width

        d = jnp.maximum(d_acc[...], 1e-30)
        inv = pl.reciprocal(d, approx=True)          # EUP slot
        inv = inv * (2.0 - d * inv)                  # 1 Newton step -> f32 accuracy
        c = jnp.where(d_acc[...] > 0, c_acc[...] * inv, 0.0)             # (TV, Hp)
        # ELU; exp argument clamped to <= 0 so the untaken branch stays finite
        context = jnp.where(c > 0, c, jnp.exp(jnp.minimum(c, 0.0)) - 1.0)

        # GRUCell, gate columns at 128-aligned offsets: [r | z | n_i | n_h]
        g = (jnp.dot(context, Wgc_ref[...], preferred_element_type=jnp.float32)
             + jnp.dot(h, Wgh_ref[...], preferred_element_type=jnp.float32)
             + bg_ref[...])                                              # (TV, 4G)
        r_g = jax.nn.sigmoid(g[:, 0:gw])
        z_g = jax.nn.sigmoid(g[:, gw:2 * gw])
        n_g = jnp.tanh(g[:, 2 * gw:3 * gw] + r_g * g[:, 3 * gw:4 * gw])
        h_new = (1.0 - z_g) * n_g + z_g * h
        out_ref[...] = jnp.maximum(h_new, 0.0)                           # (TV, G)


def attentive_gru1(dst, edge_logits, edge_feats, node_feats, params,
                   *, tile_v=256, tile_e=2048, max_edge_tiles_per_vtile=None,
                   vmem_limit_bytes=48 * 1024 * 1024):
    """dst: (E,) int32 edge-destination node ids (the DGL graph structure)."""
    V, Fn = node_feats.shape
    E, Fe = edge_feats.shape
    He = params['We'].shape[1]
    G = _round_up(Fn, 128)        # lane-padded gate / hidden / output width
    Hp = _round_up(He, 128)       # lane-padded edge-hidden width

    # Tile sizes: (8,128)-aligned; keep >=2 V tiles when possible (v7x megacore).
    tv = max(8, min(_round_up(tile_v, 8), _round_up((V + 1) // 2, 8)))
    te = max(128, min(_round_up(tile_e, 128), _round_up(E, 128)))
    Vp = _round_up(V, tv)
    Ep = _round_up(E, te)
    num_v_tiles = Vp // tv
    num_e_tiles = Ep // te

    # ---- sort edges by destination: each V tile owns a contiguous edge range
    dst = dst.astype(jnp.int32)
    order = jnp.argsort(dst)
    dst_s = dst[order]
    ref_logit = jnp.max(edge_logits)                  # softmax is shift-invariant
    logit_s = (edge_logits[:, 0] - ref_logit)[order]
    efeat_s = edge_feats[order]

    # per-V-tile edge-tile window -> scalar-prefetch arguments
    bounds = jnp.arange(num_v_tiles + 1, dtype=jnp.int32) * tv
    cuts = jnp.searchsorted(dst_s, bounds).astype(jnp.int32)
    lo, hi = cuts[:-1], cuts[1:]
    start_tile = jnp.clip(lo // te, 0, num_e_tiles - 1).astype(jnp.int32)
    n_tiles = jnp.where(hi > lo, (hi - 1) // te - lo // te + 1, 0).astype(jnp.int32)
    if max_edge_tiles_per_vtile is None:
        # host-side max; pass explicitly if the wrapper must stay jittable
        max_edge_tiles_per_vtile = max(1, int(jax.device_get(jnp.max(n_tiles))))

    # padded, lane-dense operands (padded edges: dst = Vp -> never incident)
    dst_p = jnp.full((1, Ep), Vp, jnp.int32).at[0, :E].set(dst_s)
    logit_p = jnp.full((1, Ep), -2.0 * LOGIT_CLAMP, jnp.float32).at[0, :E].set(logit_s)
    efeat_p = jnp.zeros((Ep, Fe), jnp.float32).at[:E].set(efeat_s)
    nfeat_p = jnp.zeros((Vp, G), jnp.float32).at[:V, :Fn].set(node_feats)

    # edge_transform weights, lane-padded to Hp
    We_p = jnp.zeros((Fe, Hp), jnp.float32).at[:, :He].set(params['We'])
    be_p = jnp.zeros((1, Hp), jnp.float32).at[:, :He].set(params['be'])

    # GRUCell as two matmuls (no in-kernel concat), gate blocks at 128-aligned
    # lane offsets: columns = [r | z | n_i | n_h], each block G lanes wide.
    Wih, Whh = params['Wih'], params['Whh']           # (He, 3Fn), (Fn, 3Fn)
    bih, bhh = params['bih'], params['bhh']           # (1, 3Fn)
    Wgc = jnp.zeros((Hp, 4 * G), jnp.float32)
    Wgc = Wgc.at[:He, 0:Fn].set(Wih[:, 0:Fn])
    Wgc = Wgc.at[:He, G:G + Fn].set(Wih[:, Fn:2 * Fn])
    Wgc = Wgc.at[:He, 2 * G:2 * G + Fn].set(Wih[:, 2 * Fn:3 * Fn])
    Wgh = jnp.zeros((G, 4 * G), jnp.float32)
    Wgh = Wgh.at[:Fn, 0:Fn].set(Whh[:, 0:Fn])
    Wgh = Wgh.at[:Fn, G:G + Fn].set(Whh[:, Fn:2 * Fn])
    Wgh = Wgh.at[:Fn, 3 * G:3 * G + Fn].set(Whh[:, 2 * Fn:3 * Fn])
    bg = jnp.zeros((1, 4 * G), jnp.float32)
    bg = bg.at[:, 0:Fn].set(bih[:, 0:Fn] + bhh[:, 0:Fn])
    bg = bg.at[:, G:G + Fn].set(bih[:, Fn:2 * Fn] + bhh[:, Fn:2 * Fn])
    bg = bg.at[:, 2 * G:2 * G + Fn].set(bih[:, 2 * Fn:3 * Fn])
    bg = bg.at[:, 3 * G:3 * G + Fn].set(bhh[:, 2 * Fn:3 * Fn])

    # edge-tile index: start[iv] + ie, clamped to this V tile's last valid tile
    # (clamping keeps the block index constant -> no redundant DMAs).
    def edge_tile(iv, ie, st_ref, nt_ref):
        last = st_ref[iv] + jnp.maximum(nt_ref[iv], 1) - 1
        return jnp.minimum(st_ref[iv] + ie, last)

    grid = (num_v_tiles, max_edge_tiles_per_vtile)

    out_padded = pl.pallas_call(
        _attentive_gru1_kernel,
        out_shape=jax.ShapeDtypeStruct((Vp, G), jnp.float32),
        grid_spec=pltpu.PrefetchScalarGridSpec(
            num_scalar_prefetch=2,
            grid=grid,
            in_specs=[
                pl.BlockSpec((1, te), lambda iv, ie, st, nt: (0, edge_tile(iv, ie, st, nt))),
                pl.BlockSpec((1, te), lambda iv, ie, st, nt: (0, edge_tile(iv, ie, st, nt))),
                pl.BlockSpec((te, Fe), lambda iv, ie, st, nt: (edge_tile(iv, ie, st, nt), 0)),
                pl.BlockSpec((tv, G), lambda iv, ie, st, nt: (iv, 0)),        # node feats
                pl.BlockSpec((Fe, Hp), lambda iv, ie, st, nt: (0, 0)),        # We
                pl.BlockSpec((1, Hp), lambda iv, ie, st, nt: (0, 0)),         # be
                pl.BlockSpec((Hp, 4 * G), lambda iv, ie, st, nt: (0, 0)),     # Wgc
                pl.BlockSpec((G, 4 * G), lambda iv, ie, st, nt: (0, 0)),      # Wgh
                pl.BlockSpec((1, 4 * G), lambda iv, ie, st, nt: (0, 0)),      # bg
            ],
            out_specs=pl.BlockSpec((tv, G), lambda iv, ie, st, nt: (iv, 0)),
            scratch_shapes=[
                pltpu.VMEM((tv, 1), jnp.float32),    # running max
                pltpu.VMEM((tv, 1), jnp.float32),    # running denominator
                pltpu.VMEM((tv, Hp), jnp.float32),   # running weighted sum
            ],
        ),
        compiler_params=pltpu.CompilerParams(
            dimension_semantics=("parallel", "arbitrary"),
            vmem_limit_bytes=vmem_limit_bytes,
        ),
    )(start_tile, n_tiles, dst_p, logit_p, efeat_p, nfeat_p,
      We_p, be_p, Wgc, Wgh, bg)

    return out_padded[:V, :Fn]


def attentive_gru1_ref(dst, edge_logits, edge_feats, node_feats, params):
    """Plain-JAX reference of the same math (for the correctness check)."""
    V, Fn = node_feats.shape
    A = (dst[None, :] == jnp.arange(V, dtype=jnp.int32)[:, None]).astype(jnp.float32)
    t = edge_feats @ params['We'] + params['be']
    masked = jnp.where(A > 0, edge_logits[:, 0][None, :], NEG_BIG)
    m_v = jnp.max(masked, axis=1, keepdims=True)
    m_safe = jnp.where(m_v <= NEG_BIG * 0.5, 0.0, m_v)
    P = jnp.exp(masked - m_safe)
    denom = P.sum(axis=1, keepdims=True)
    c = jnp.where(denom > 0, (P @ t) / jnp.maximum(denom, 1e-30), 0.0)
    ctx = jnp.where(c > 0, c, jnp.exp(jnp.minimum(c, 0.0)) - 1.0)
    gi = ctx @ params['Wih'] + params['bih']
    gh = node_feats @ params['Whh'] + params['bhh']
    r = jax.nn.sigmoid(gi[:, :Fn] + gh[:, :Fn])
    z = jax.nn.sigmoid(gi[:, Fn:2 * Fn] + gh[:, Fn:2 * Fn])
    n = jnp.tanh(gi[:, 2 * Fn:] + r * gh[:, 2 * Fn:])
    h_new = (1.0 - z) * n + z * node_feats
    return jnp.maximum(h_new, 0.0)


if __name__ == "__main__":
    # Small deterministic problem, sized so the grid actually iterates and the
    # per-V-tile edge windows differ: V=16 -> 2 node tiles (tv=8); E=300 edges,
    # most with dst in {0..3}, so V tile 0 needs 3 edge tiles and V tile 1 only
    # 1 (exercising the clamped index map + skipped steps).  Nodes 14, 15 stay
    # isolated to exercise the empty-neighborhood path.
    V = 16
    E = 300
    node_feat_size = 32
    edge_feat_size = 16
    edge_hidden_size = 32

    key = jax.random.PRNGKey(0)
    ks = jax.random.split(key, 10)

    n_conn = V - 2
    dst_fixed = jnp.arange(n_conn, dtype=jnp.int32)
    dst_rand = jax.random.randint(ks[0], (E - n_conn,), 0, 4, dtype=jnp.int32)
    dst = jnp.concatenate([dst_fixed, dst_rand])

    edge_logits = jax.random.normal(ks[1], (E, 1), dtype=jnp.float32)
    edge_feats = jax.random.normal(ks[2], (E, edge_feat_size), dtype=jnp.float32)
    node_feats = jax.random.normal(ks[3], (V, node_feat_size), dtype=jnp.float32)

    def uniform(k, shape, fan_in):
        bound = 1.0 / np.sqrt(fan_in)
        return jax.random.uniform(k, shape, jnp.float32, -bound, bound)

    params = {
        # edge_transform Linear: torch weight (He, Fe) stored transposed
        'We': uniform(ks[4], (edge_feat_size, edge_hidden_size), edge_feat_size),
        'be': uniform(ks[5], (1, edge_hidden_size), edge_feat_size),
        # GRUCell: weight_ih (3Fn, He), weight_hh (3Fn, Fn) stored transposed
        'Wih': uniform(ks[6], (edge_hidden_size, 3 * node_feat_size), node_feat_size),
        'Whh': uniform(ks[7], (node_feat_size, 3 * node_feat_size), node_feat_size),
        'bih': uniform(ks[8], (1, 3 * node_feat_size), node_feat_size),
        'bhh': uniform(ks[9], (1, 3 * node_feat_size), node_feat_size),
    }
    # TODO(synk): Dropout in edge_transform is identity here (inference mode).

    out = attentive_gru1(dst, edge_logits, edge_feats, node_feats, params,
                         tile_v=8, tile_e=128)
    out = jax.block_until_ready(out)

    ref = attentive_gru1_ref(dst, edge_logits, edge_feats, node_feats, params)
    np.testing.assert_allclose(np.asarray(out), np.asarray(ref),
                               rtol=1e-4, atol=1e-4)
    print("KERNEL_OK")
</pallas_src>

<mosaic_0001>
module attributes {stable_mosaic.version = 11 : i64} {
  func.func @_attentive_gru1_kernel(%arg0: i32, %arg1: i32, %arg2: memref<2xi32, #tpu.memory_space<smem>>, %arg3: memref<2xi32, #tpu.memory_space<smem>>, %arg4: memref<1x128xi32, #tpu.memory_space<vmem>>, %arg5: memref<1x128xf32, #tpu.memory_space<vmem>>, %arg6: memref<128x16xf32, #tpu.memory_space<vmem>>, %arg7: memref<8x128xf32, #tpu.memory_space<vmem>>, %arg8: memref<16x128xf32, #tpu.memory_space<vmem>>, %arg9: memref<1x128xf32, #tpu.memory_space<vmem>>, %arg10: memref<128x512xf32, #tpu.memory_space<vmem>>, %arg11: memref<128x512xf32, #tpu.memory_space<vmem>>, %arg12: memref<1x512xf32, #tpu.memory_space<vmem>>, %arg13: memref<8x128xf32, #tpu.memory_space<vmem>>, %arg14: memref<8x1xf32, #tpu.memory_space<vmem>>, %arg15: memref<8x1xf32, #tpu.memory_space<vmem>>, %arg16: memref<8x128xf32, #tpu.memory_space<vmem>>) attributes {dimension_semantics = [#tpu.dimension_semantics<parallel>, #tpu.dimension_semantics<arbitrary>], iteration_bounds = array<i64: 2, 3>, scalar_prefetch = 2 : i64, scratch_operands = 3 : i64, tpu.core_type = #tpu.core_type<tc>, window_params = [{transform_indices = @transform_0, window_bounds = array<i64: 1, 128>}, {transform_indices = @transform_1, window_bounds = array<i64: 1, 128>}, {transform_indices = @transform_2, window_bounds = array<i64: 128, 16>}, {transform_indices = @transform_3, window_bounds = array<i64: 8, 128>}, {pipeline_mode = #tpu.pipeline_mode<synchronous>, transform_indices = @transform_4, window_bounds = array<i64: 16, 128>}, {pipeline_mode = #tpu.pipeline_mode<synchronous>, transform_indices = @transform_5, window_bounds = array<i64: 1, 128>}, {pipeline_mode = #tpu.pipeline_mode<synchronous>, transform_indices = @transform_6, window_bounds = array<i64: 128, 512>}, {pipeline_mode = #tpu.pipeline_mode<synchronous>, transform_indices = @transform_7, window_bounds = array<i64: 128, 512>}, {pipeline_mode = #tpu.pipeline_mode<synchronous>, transform_indices = @transform_8, window_bounds = array<i64: 1, 512>}, {transform_indices = @transform_9, window_bounds = array<i64: 8, 128>}]} {
    %c0_i32 = arith.constant 0 : i32
    %0 = arith.cmpi eq, %arg1, %c0_i32 : i32
    %1 = arith.extui %0 : i1 to i32
    %c0_i32_0 = arith.constant 0 : i32
    %2 = arith.cmpi ne, %1, %c0_i32_0 : i32
    scf.if %2 {
      %cst = arith.constant -4.000000e+01 : f32
      %11 = vector.broadcast %cst : f32 to vector<8x1xf32>
      %c0 = arith.constant 0 : index
      %c0_3 = arith.constant 0 : index
      %12 = vector.load %arg14[%c0, %c0_3] : memref<8x1xf32, #tpu.memory_space<vmem>>, vector<8x1xf32>
      tpu.vector_store %arg14[%c0, %c0_3], %11 {strides = array<i32>} : memref<8x1xf32, #tpu.memory_space<vmem>>, vector<8x1xf32>,
      %cst_4 = arith.constant 0.000000e+00 : f32
      %13 = vector.broadcast %cst_4 : f32 to vector<8x1xf32>
      %c0_5 = arith.constant 0 : index
      %c0_6 = arith.constant 0 : index
      %14 = vector.load %arg15[%c0_5, %c0_6] : memref<8x1xf32, #tpu.memory_space<vmem>>, vector<8x1xf32>
      tpu.vector_store %arg15[%c0_5, %c0_6], %13 {strides = array<i32>} : memref<8x1xf32, #tpu.memory_space<vmem>>, vector<8x1xf32>,
      %cst_7 = arith.constant 0.000000e+00 : f32
      %15 = vector.broadcast %cst_7 : f32 to vector<8x128xf32>
      %c0_8 = arith.constant 0 : index
      %c0_9 = arith.constant 0 : index
      %16 = vector.load %arg16[%c0_8, %c0_9] : memref<8x128xf32, #tpu.memory_space<vmem>>, vector<8x128xf32>
      tpu.vector_store %arg16[%c0_8, %c0_9], %15 {strides = array<i32>} : memref<8x128xf32, #tpu.memory_space<vmem>>, vector<8x128xf32>,
    } else {
    }
    %3 = arith.index_cast %arg0 : i32 to index
    %4 = memref.load %arg3[%3] : memref<2xi32, #tpu.memory_space<smem>>
    %5 = arith.cmpi slt, %arg1, %4 : i32
    %6 = arith.extui %5 : i1 to i32
    %c0_i32_1 = arith.constant 0 : i32
    %7 = arith.cmpi ne, %6, %c0_i32_1 : i32
    scf.if %7 {
      %c0 = arith.constant 0 : index
      %c0_3 = arith.constant 0 : index
      %11 = vector.load %arg6[%c0, %c0_3] : memref<128x16xf32, #tpu.memory_space<vmem>>, vector<128x16xf32>
      %c0_4 = arith.constant 0 : index
      %c0_5 = arith.constant 0 : index
      %12 = vector.load %arg8[%c0_4, %c0_5] : memref<16x128xf32, #tpu.memory_space<vmem>>, vector<16x128xf32>
      %cst = arith.constant dense<0.000000e+00> : vector<128x128xf32>
      %13 = tpu.matmul %11, %12, %cst {dimension_numbers = #tpu.dot_dimension_numbers<[1], [0], [0], [1], [0, 0, 1, 1], [], []>} : vector<128x16xf32>, vector<16x128xf32>, vector<128x128xf32> -> vector<128x128xf32>
      %c0_6 = arith.constant 0 : index
      %c0_7 = arith.constant 0 : index
      %14 = vector.load %arg9[%c0_6, %c0_7] : memref<1x128xf32, #tpu.memory_space<vmem>>, vector<1x128xf32>
      %15 = vector.broadcast %14 : vector<1x128xf32> to vector<128x128xf32>
      %16 = arith.addf %13, %15 : vector<128x128xf32>
      %c8_i32 = arith.constant 8 : i32
      %17 = arith.muli %arg0, %c8_i32 : i32
      %18 = tpu.iota {dimensions = array<i32: 0>} : vector<8x1xi32>
      %19 = vector.broadcast %17 : i32 to vector<8x1xi32>
      %20 = arith.addi %19, %18 : vector<8x1xi32>
      %c0_8 = arith.constant 0 : index
      %c0_9 = arith.constant 0 : index
      %21 = vector.load %arg4[%c0_8, %c0_9] : memref<1x128xi32, #tpu.memory_space<vmem>>, vector<1x128xi32>
      %22 = vector.broadcast %21 : vector<1x128xi32> to vector<8x128xi32>
      %23 = vector.broadcast %20 : vector<8x1xi32> to vector<8x128xi32>
      %24 = arith.cmpi eq, %22, %23 : vector<8x128xi32>
      %c0_10 = arith.constant 0 : index
      %c0_11 = arith.constant 0 : index
      %25 = vector.load %arg5[%c0_10, %c0_11] : memref<1x128xf32, #tpu.memory_space<vmem>>, vector<1x128xf32>
      %cst_12 = arith.constant -1.000000e+30 : f32
      %26 = vector.shape_cast %25 : vector<1x128xf32> to vector<1x128xf32>
      %27 = vector.broadcast %26 : vector<1x128xf32> to vector<8x128xf32>
      %28 = vector.broadcast %cst_12 : f32 to vector<8x128xf32>
      %29 = arith.select %24, %27, %28 : vector<8x128xi1>, vector<8x128xf32>
      %c0_13 = arith.constant 0 : index
      %c0_14 = arith.constant 0 : index
      %30 = vector.load %arg14[%c0_13, %c0_14] : memref<8x1xf32, #tpu.memory_space<vmem>>, vector<8x1xf32>
      %cst_15 = arith.constant dense<0xFF800000> : vector<8xf32>
      %31 = vector.multi_reduction <maximumf>, %29, %cst_15 [1] : vector<8x128xf32> to vector<8xf32>
      %32 = vector.shape_cast %31 : vector<8xf32> to vector<8x1xf32>
      %33 = arith.maximumf %30, %32 : vector<8x1xf32>
      %34 = arith.subf %30, %33 : vector<8x1xf32>
      %35 = math.exp %34 : vector<8x1xf32>
      %36 = math.exp %25 : vector<1x128xf32>
      %cst_16 = arith.constant 0.000000e+00 : f32
      %37 = vector.broadcast %cst_16 : f32 to vector<8x1xf32>
      %38 = arith.subf %37, %33 : vector<8x1xf32>
      %39 = math.exp %38 : vector<8x1xf32>
      %40 = vector.broadcast %36 : vector<1x128xf32> to vector<8x128xf32>
      %41 = vector.broadcast %39 : vector<8x1xf32> to vector<8x128xf32>
      %42 = arith.mulf %40, %41 : vector<8x128xf32>
      %cst_17 = arith.constant 0.000000e+00 : f32
      %43 = vector.broadcast %cst_17 : f32 to vector<8x128xf32>
      %44 = arith.select %24, %42, %43 : vector<8x128xi1>, vector<8x128xf32>
      %c0_18 = arith.constant 0 : index
      %c0_19 = arith.constant 0 : index
      %45 = vector.load %arg15[%c0_18, %c0_19] : memref<8x1xf32, #tpu.memory_space<vmem>>, vector<8x1xf32>
      %46 = arith.mulf %35, %45 : vector<8x1xf32>
      %cst_20 = arith.constant dense<0.000000e+00> : vector<8xf32>
      %47 = vector.multi_reduction <add>, %44, %cst_20 [1] : vector<8x128xf32> to vector<8xf32>
      %48 = vector.shape_cast %47 : vector<8xf32> to vector<8x1xf32>
      %49 = arith.addf %46, %48 : vector<8x1xf32>
      %c0_21 = arith.constant 0 : index
      %c0_22 = arith.constant 0 : index
      %50 = vector.load %arg15[%c0_21, %c0_22] : memref<8x1xf32, #tpu.memory_space<vmem>>, vector<8x1xf32>
      tpu.vector_store %arg15[%c0_21, %c0_22], %49 {strides = array<i32>} : memref<8x1xf32, #tpu.memory_space<vmem>>, vector<8x1xf32>,
      %c0_23 = arith.constant 0 : index
      %c0_24 = arith.constant 0 : index
      %51 = vector.load %arg16[%c0_23, %c0_24] : memref<8x128xf32, #tpu.memory_space<vmem>>, vector<8x128xf32>
      %52 = vector.broadcast %35 : vector<8x1xf32> to vector<8x128xf32>
      %53 = arith.mulf %52, %51 : vector<8x128xf32>
      %cst_25 = arith.constant dense<0.000000e+00> : vector<8x128xf32>
      %54 = tpu.matmul %44, %16, %cst_25 {dimension_numbers = #tpu.dot_dimension_numbers<[1], [0], [0], [1], [0, 0, 1, 1], [], []>} : vector<8x128xf32>, vector<128x128xf32>, vector<8x128xf32> -> vector<8x128xf32>
      %55 = arith.addf %53, %54 : vector<8x128xf32>
      %c0_26 = arith.constant 0 : index
      %c0_27 = arith.constant 0 : index
      %56 = vector.load %arg16[%c0_26, %c0_27] : memref<8x128xf32, #tpu.memory_space<vmem>>, vector<8x128xf32>
      tpu.vector_store %arg16[%c0_26, %c0_27], %55 {strides = array<i32>} : memref<8x128xf32, #tpu.memory_space<vmem>>, vector<8x128xf32>,
      %c0_28 = arith.constant 0 : index
      %c0_29 = arith.constant 0 : index
      %57 = vector.load %arg14[%c0_28, %c0_29] : memref<8x1xf32, #tpu.memory_space<vmem>>, vector<8x1xf32>
      tpu.vector_store %arg14[%c0_28, %c0_29], %33 {strides = array<i32>} : memref<8x1xf32, #tpu.memory_space<vmem>>, vector<8x1xf32>,
    } else {
    }
    %c2_i32 = arith.constant 2 : i32
    %8 = arith.cmpi eq, %arg1, %c2_i32 : i32
    %9 = arith.extui %8 : i1 to i32
    %c0_i32_2 = arith.constant 0 : i32
    %10 = arith.cmpi ne, %9, %c0_i32_2 : i32
    scf.if %10 {
      %c0 = arith.constant 0 : index
      %c0_3 = arith.constant 0 : index
      %11 = vector.load %arg7[%c0, %c0_3] : memref<8x128xf32, #tpu.memory_space<vmem>>, vector<8x128xf32>
      %c0_4 = arith.constant 0 : index
      %c0_5 = arith.constant 0 : index
      %12 = vector.load %arg15[%c0_4, %c0_5] : memref<8x1xf32, #tpu.memory_space<vmem>>, vector<8x1xf32>
      %cst = arith.constant 1.000000e-30 : f32
      %13 = vector.broadcast %cst : f32 to vector<8x1xf32>
      %14 = arith.maximumf %12, %13 : vector<8x1xf32>
      %15 = tpu.reciprocal %14 {approx = true} : vector<8x1xf32> -> vector<8x1xf32>
      %16 = arith.mulf %14, %15 : vector<8x1xf32>
      %cst_6 = arith.constant 2.000000e+00 : f32
      %17 = vector.broadcast %cst_6 : f32 to vector<8x1xf32>
      %18 = arith.subf %17, %16 : vector<8x1xf32>
      %19 = arith.mulf %15, %18 : vector<8x1xf32>
      %c0_7 = arith.constant 0 : index
      %c0_8 = arith.constant 0 : index
      %20 = vector.load %arg15[%c0_7, %c0_8] : memref<8x1xf32, #tpu.memory_space<vmem>>, vector<8x1xf32>
      %cst_9 = arith.constant 0.000000e+00 : f32
      %21 = vector.broadcast %cst_9 : f32 to vector<8x1xf32>
      %22 = arith.cmpf ogt, %20, %21 : vector<8x1xf32>
      %c0_10 = arith.constant 0 : index
      %c0_11 = arith.constant 0 : index
      %23 = vector.load %arg16[%c0_10, %c0_11] : memref<8x128xf32, #tpu.memory_space<vmem>>, vector<8x128xf32>
      %24 = vector.broadcast %19 : vector<8x1xf32> to vector<8x128xf32>
      %25 = arith.mulf %23, %24 : vector<8x128xf32>
      %cst_12 = arith.constant 0.000000e+00 : f32
      %26 = vector.shape_cast %22 : vector<8x1xi1> to vector<8x1xi1>
      %27 = vector.broadcast %26 : vector<8x1xi1> to vector<8x128xi1>
      %28 = vector.broadcast %cst_12 : f32 to vector<8x128xf32>
      %29 = arith.select %27, %25, %28 : vector<8x128xi1>, vector<8x128xf32>
      %cst_13 = arith.constant 0.000000e+00 : f32
      %30 = vector.broadcast %cst_13 : f32 to vector<8x128xf32>
      %31 = arith.cmpf ogt, %29, %30 : vector<8x128xf32>
      %cst_14 = arith.constant 0.000000e+00 : f32
      %32 = vector.broadcast %cst_14 : f32 to vector<8x128xf32>
      %33 = arith.minimumf %29, %32 : vector<8x128xf32>
      %34 = math.exp %33 : vector<8x128xf32>
      %cst_15 = arith.constant 1.000000e+00 : f32
      %35 = vector.broadcast %cst_15 : f32 to vector<8x128xf32>
      %36 = arith.subf %34, %35 : vector<8x128xf32>
      %37 = arith.select %31, %29, %36 : vector<8x128xi1>, vector<8x128xf32>
      %c0_16 = arith.constant 0 : index
      %c0_17 = arith.constant 0 : index
      %38 = vector.load %arg10[%c0_16, %c0_17] : memref<128x512xf32, #tpu.memory_space<vmem>>, vector<128x512xf32>
      %cst_18 = arith.constant dense<0.000000e+00> : vector<8x512xf32>
      %39 = tpu.matmul %37, %38, %cst_18 {dimension_numbers = #tpu.dot_dimension_numbers<[1], [0], [0], [1], [0, 0, 1, 1], [], []>} : vector<8x128xf32>, vector<128x512xf32>, vector<8x512xf32> -> vector<8x512xf32>
      %c0_19 = arith.constant 0 : index
      %c0_20 = arith.constant 0 : index
      %40 = vector.load %arg11[%c0_19, %c0_20] : memref<128x512xf32, #tpu.memory_space<vmem>>, vector<128x512xf32>
      %cst_21 = arith.constant dense<0.000000e+00> : vector<8x512xf32>
      %41 = tpu.matmul %11, %40, %cst_21 {dimension_numbers = #tpu.dot_dimension_numbers<[1], [0], [0], [1], [0, 0, 1, 1], [], []>} : vector<8x128xf32>, vector<128x512xf32>, vector<8x512xf32> -> vector<8x512xf32>
      %42 = arith.addf %39, %41 : vector<8x512xf32>
      %c0_22 = arith.constant 0 : index
      %c0_23 = arith.constant 0 : index
      %43 = vector.load %arg12[%c0_22, %c0_23] : memref<1x512xf32, #tpu.memory_space<vmem>>, vector<1x512xf32>
      %44 = vector.broadcast %43 : vector<1x512xf32> to vector<8x512xf32>
      %45 = arith.addf %42, %44 : vector<8x512xf32>
      %46 = vector.extract_strided_slice %45 {offsets = [0, 0], sizes = [8, 128], strides = [1, 1]} : vector<8x512xf32> to vector<8x128xf32>
      %47 = arith.negf %46 : vector<8x128xf32>
      %48 = math.exp %47 : vector<8x128xf32>
      %cst_24 = arith.constant 1.000000e+00 : f32
      %49 = vector.broadcast %cst_24 : f32 to vector<8x128xf32>
      %50 = arith.addf %49, %48 : vector<8x128xf32>
      %51 = arith.divf %49, %50 : vector<8x128xf32>
      %52 = vector.extract_strided_slice %45 {offsets = [0, 128], sizes = [8, 128], strides = [1, 1]} : vector<8x512xf32> to vector<8x128xf32>
      %53 = arith.negf %52 : vector<8x128xf32>
      %54 = math.exp %53 : vector<8x128xf32>
      %cst_25 = arith.constant 1.000000e+00 : f32
      %55 = vector.broadcast %cst_25 : f32 to vector<8x128xf32>
      %56 = arith.addf %55, %54 : vector<8x128xf32>
      %57 = arith.divf %55, %56 : vector<8x128xf32>
      %58 = vector.extract_strided_slice %45 {offsets = [0, 256], sizes = [8, 128], strides = [1, 1]} : vector<8x512xf32> to vector<8x128xf32>
      %59 = vector.extract_strided_slice %45 {offsets = [0, 384], sizes = [8, 128], strides = [1, 1]} : vector<8x512xf32> to vector<8x128xf32>
      %60 = arith.mulf %51, %59 : vector<8x128xf32>
      %61 = arith.addf %58, %60 : vector<8x128xf32>
      %62 = math.tanh %61 : vector<8x128xf32>
      %cst_26 = arith.constant 1.000000e+00 : f32
      %63 = vector.broadcast %cst_26 : f32 to vector<8x128xf32>
      %64 = arith.subf %63, %57 : vector<8x128xf32>
      %65 = arith.mulf %64, %62 : vector<8x128xf32>
      %66 = arith.mulf %57, %11 : vector<8x128xf32>
      %67 = arith.addf %65, %66 : vector<8x128xf32>
      %cst_27 = arith.constant 0.000000e+00 : f32
      %68 = vector.broadcast %cst_27 : f32 to vector<8x128xf32>
      %69 = arith.maximumf %67, %68 : vector<8x128xf32>
      %c0_28 = arith.constant 0 : index
      %c0_29 = arith.constant 0 : index
      %70 = vector.load %arg13[%c0_28, %c0_29] : memref<8x128xf32, #tpu.memory_space<vmem>>, vector<8x128xf32>
      tpu.vector_store %arg13[%c0_28, %c0_29], %69 {strides = array<i32>} : memref<8x128xf32, #tpu.memory_space<vmem>>, vector<8x128xf32>,
    } else {
    }
    return
  }
  func.func @transform_0(%arg0: i32, %arg1: i32, %arg2: memref<2xi32, #tpu.memory_space<smem>>, %arg3: memref<2xi32, #tpu.memory_space<smem>>) -> (i32, i32) {
    %0 = arith.index_cast %arg0 : i32 to index
    %1 = memref.load %arg2[%0] : memref<2xi32, #tpu.memory_space<smem>>
    %2 = arith.index_cast %arg0 : i32 to index
    %3 = memref.load %arg3[%2] : memref<2xi32, #tpu.memory_space<smem>>
    %c1_i32 = arith.constant 1 : i32
    %4 = arith.maxsi %3, %c1_i32 : i32
    %5 = arith.addi %1, %4 : i32
    %c1_i32_0 = arith.constant 1 : i32
    %6 = arith.subi %5, %c1_i32_0 : i32
    %7 = arith.index_cast %arg0 : i32 to index
    %8 = memref.load %arg2[%7] : memref<2xi32, #tpu.memory_space<smem>>
    %9 = arith.addi %8, %arg1 : i32
    %10 = arith.minsi %9, %6 : i32
    %c0_i32 = arith.constant 0 : i32
    %c0_i32_1 = arith.constant 0 : i32
    return %c0_i32, %10 : i32, i32
  }
  func.func @transform_1(%arg0: i32, %arg1: i32, %arg2: memref<2xi32, #tpu.memory_space<smem>>, %arg3: memref<2xi32, #tpu.memory_space<smem>>) -> (i32, i32) {
    %0 = arith.index_cast %arg0 : i32 to index
    %1 = memref.load %arg2[%0] : memref<2xi32, #tpu.memory_space<smem>>
    %2 = arith.index_cast %arg0 : i32 to index
    %3 = memref.load %arg3[%2] : memref<2xi32, #tpu.memory_space<smem>>
    %c1_i32 = arith.constant 1 : i32
    %4 = arith.maxsi %3, %c1_i32 : i32
    %5 = arith.addi %1, %4 : i32
    %c1_i32_0 = arith.constant 1 : i32
    %6 = arith.subi %5, %c1_i32_0 : i32
    %7 = arith.index_cast %arg0 : i32 to index
    %8 = memref.load %arg2[%7] : memref<2xi32, #tpu.memory_space<smem>>
    %9 = arith.addi %8, %arg1 : i32
    %10 = arith.minsi %9, %6 : i32
    %c0_i32 = arith.constant 0 : i32
    %c0_i32_1 = arith.constant 0 : i32
    return %c0_i32, %10 : i32, i32
  }
  func.func @transform_2(%arg0: i32, %arg1: i32, %arg2: memref<2xi32, #tpu.memory_space<smem>>, %arg3: memref<2xi32, #tpu.memory_space<smem>>) -> (i32, i32) {
    %0 = arith.index_cast %arg0 : i32 to index
    %1 = memref.load %arg2[%0] : memref<2xi32, #tpu.memory_space<smem>>
    %2 = arith.index_cast %arg0 : i32 to index
    %3 = memref.load %arg3[%2] : memref<2xi32, #tpu.memory_space<smem>>
    %c1_i32 = arith.constant 1 : i32
    %4 = arith.maxsi %3, %c1_i32 : i32
    %5 = arith.addi %1, %4 : i32
    %c1_i32_0 = arith.constant 1 : i32
    %6 = arith.subi %5, %c1_i32_0 : i32
    %7 = arith.index_cast %arg0 : i32 to index
    %8 = memref.load %arg2[%7] : memref<2xi32, #tpu.memory_space<smem>>
    %9 = arith.addi %8, %arg1 : i32
    %10 = arith.minsi %9, %6 : i32
    %c0_i32 = arith.constant 0 : i32
    %c0_i32_1 = arith.constant 0 : i32
    return %10, %c0_i32 : i32, i32
  }
  func.func @transform_3(%arg0: i32, %arg1: i32, %arg2: memref<2xi32, #tpu.memory_space<smem>>, %arg3: memref<2xi32, #tpu.memory_space<smem>>) -> (i32, i32) {
    %c0_i32 = arith.constant 0 : i32
    %c0_i32_0 = arith.constant 0 : i32
    return %arg0, %c0_i32 : i32, i32
  }
  func.func @transform_4(%arg0: i32, %arg1: i32, %arg2: memref<2xi32, #tpu.memory_space<smem>>, %arg3: memref<2xi32, #tpu.memory_space<smem>>) -> (i32, i32) {
    %c0_i32 = arith.constant 0 : i32
    %c0_i32_0 = arith.constant 0 : i32
    %c0_i32_1 = arith.constant 0 : i32
    return %c0_i32, %c0_i32_0 : i32, i32
  }
  func.func @transform_5(%arg0: i32, %arg1: i32, %arg2: memref<2xi32, #tpu.memory_space<smem>>, %arg3: memref<2xi32, #tpu.memory_space<smem>>) -> (i32, i32) {
    %c0_i32 = arith.constant 0 : i32
    %c0_i32_0 = arith.constant 0 : i32
    %c0_i32_1 = arith.constant 0 : i32
    return %c0_i32, %c0_i32_0 : i32, i32
  }
  func.func @transform_6(%arg0: i32, %arg1: i32, %arg2: memref<2xi32, #tpu.memory_space<smem>>, %arg3: memref<2xi32, #tpu.memory_space<smem>>) -> (i32, i32) {
    %c0_i32 = arith.constant 0 : i32
    %c0_i32_0 = arith.constant 0 : i32
    %c0_i32_1 = arith.constant 0 : i32
    return %c0_i32, %c0_i32_0 : i32, i32
  }
  func.func @transform_7(%arg0: i32, %arg1: i32, %arg2: memref<2xi32, #tpu.memory_space<smem>>, %arg3: memref<2xi32, #tpu.memory_space<smem>>) -> (i32, i32) {
    %c0_i32 = arith.constant 0 : i32
    %c0_i32_0 = arith.constant 0 : i32
    %c0_i32_1 = arith.constant 0 : i32
    return %c0_i32, %c0_i32_0 : i32, i32
  }
  func.func @transform_8(%arg0: i32, %arg1: i32, %arg2: memref<2xi32, #tpu.memory_space<smem>>, %arg3: memref<2xi32, #tpu.memory_space<smem>>) -> (i32, i32) {
    %c0_i32 = arith.constant 0 : i32
    %c0_i32_0 = arith.constant 0 : i32
    %c0_i32_1 = arith.constant 0 : i32
    return %c0_i32, %c0_i32_0 : i32, i32
  }
  func.func @transform_9(%arg0: i32, %arg1: i32, %arg2: memref<2xi32, #tpu.memory_space<smem>>, %arg3: memref<2xi32, #tpu.memory_space<smem>>) -> (i32, i32) {
    %c0_i32 = arith.constant 0 : i32
    %c0_i32_0 = arith.constant 0 : i32
    return %arg0, %c0_i32 : i32, i32
  }
}

</mosaic_0001>

<bundles_post_ra>
// kernel: tpu_custom_call.1
= control target key start
LH: loop header
LB: loop body
LE: loop exit
PB: predicated region body
PF: predicated region fallthrough
CT: control target
= control target key end

     0   :  { %s2485_s0 = inlined_call_operand.vmem [shape: s32[2], index: 0, kind: input, shape index: {}]   ;;  %s2486_s2 = inlined_call_operand.vmem [shape: s32[1,384], index: 2, kind: input, shape index: {}]   ;;  %s2487_s3 = inlined_call_operand.vmem [shape: f32[1,384], index: 3, kind: input, shape index: {}]   ;;  %s2488_s4 = inlined_call_operand.vmem [shape: f32[384,16], index: 4, kind: input, shape index: {}]   ;;  %s2489_s5 = inlined_call_operand.vmem [shape: f32[16,128], index: 5, kind: input, shape index: {}]   ;;  %s2490_s6 = inlined_call_operand.vmem [shape: f32[16,128], index: 6, kind: input, shape index: {}]   ;;  %s2491_s7 = inlined_call_operand.vmem [shape: f32[1,128], index: 7, kind: input, shape index: {}]   ;;  %s2492_s8 = inlined_call_operand.hbm [shape: f32[128,512], index: 8, kind: input, shape index: {}]   ;;  %s2493_s9 = inlined_call_operand.hbm [shape: f32[128,512], index: 9, kind: input, shape index: {}]   ;;  %s2494_s10 = inlined_call_operand.vmem [shape: f32[1,512], index: 10, kind: input, shape index: {}]   ;;  %s2495_s11 = inlined_call_operand.hbm [shape: f32[16,128], index: 11, kind: output, shape index: {}]   ;;  %s2496_s1 = inlined_call_operand.vmem [shape: s32[2], index: 1, kind: input, shape index: {}]  }
   0x1   :  { %2506 = sst [smem:[#allocation27_spill]] %s2492_s8  ;;  %s16_s19 = sshll.u32 %s2485_s0, 4  ;;  %s17_s19 = int_to_ptr.vmem [resolvable:$true] %s16_s19 }
   0x2   :  { %2507 = sst [smem:[#allocation28_spill]] %s2493_s9  ;;  %s20_s22 = sshll.u32 %s2496_s1, 4  ;;  %s21_s22 = int_to_ptr.vmem [resolvable:$true] %s20_s22 }
   0x3   :  { %s1886_s23 = scalar_lea.vmem %s17_s19, 16  ;;  %p1891_p1 = scmp.lt.s32.totalorder %s17_s19, %s17_s19 }
   0x4   :  { %p1887_p0 = scmp.ne.s32.totalorder %s17_s19, %s1886_s23  ;;  %p1892_p2 = scmp.lt.s32.totalorder %s1886_s23, %s1886_s23 }
   0x6   :  { %p1893_p3 = por %p1892_p2, %p1891_p1 }
   0x8   :  { %p1894_p4 = pnand %p1893_p3, %p1887_p0 }
   0xa   :  { %1897 = shalt.err (!%p1894_p4)  }
   0xb   :  { %s2066_s24 = smov [#allocation6]   ;;  %s1898_s25 = scalar_lea.vmem %s21_s22, 16 }
   0xc   :  { %19 = dma.vmem_to_smem %s17_s19, 16, %s2066_s24, [#allocation5] }
   0xd   :  { %p1899_p5 = scmp.ne.s32.totalorder %s21_s22, %s1898_s25  ;;  %p1903_p6 = scmp.lt.s32.totalorder %s21_s22, %s21_s22 }
   0xe   :  { %p1904_p7 = scmp.lt.s32.totalorder %s1898_s25, %s1898_s25 }
  0x10   :  { %p1905_p8 = por %p1904_p7, %p1903_p6 }
  0x12   :  { %p1906_p9 = pnand %p1905_p8, %p1899_p5 }
  0x14   :  { %1909 = shalt.err (!%p1906_p9)  }
  0x15   :  { %s2067_s0 = smov [#allocation7]  }
  0x16   :  { %23 = dma.vmem_to_smem %s21_s22, 16, %s2067_s0, [#allocation5] }
  0x17   :  { %2020 = dma.done.wait [#allocation5], 32 }
  0x18   :  { %2021 = vsyncadd [#allocation5], 4294967264 }
  0x19   :  { %25 = sfence }
  0x1a   :  { %26 = vsyncpa [#allocation9], 0 }
  0x1b   :  { %27 = vsyncpa [#allocation12], 0 }
  0x1c   :  { %28 = vsyncpa [#allocation10], 0 }
  0x1d   :  { %30 = vsyncpa [#allocation10 + $0x1], 0  ;;  %s2146_s1 = smov 0   ;;  %s2148_s26 = smov 0  }
  0x1e   :  { %s2150_s27 = smov 0   ;;  %s2152_s28 = smov 0  }
  0x1f   :  { %s2154_s29 = smov 0   ;;  %s2156_s30 = smov 0  }
  0x20   :  { %s2158_s12 = smov 0   ;;  %s2160_s13 = smov 0  }
  0x21 LB: > { %2508 = sst [smem:[#allocation18_spill]] %s2036_s1  ;;  %s1610_s14 = sadd.s32 4294967295, %s2064_s13   ;;  %s2064_s13 = sphi %s2160_s13, %s36_s13   ;;  %s2060_s12 = sphi %s2158_s12, %s2534_s12   ;;  %s2056_s30 = sphi %s2156_s30, %s2533_s30   ;;  %s2052_s29 = sphi %s2154_s29, %s2532_s29   ;;  %s2048_s28 = sphi %s2152_s28, %s2531_s28   ;;  %s2044_s27 = sphi %s2150_s27, %s2530_s27   ;;  %s2040_s26 = sphi %s2148_s26, %s2536_s26   ;;  %s2036_s1 = sphi %s2146_s1, %s2535_s1  }
  0x22   : > { %2509 = sst [smem:[#allocation19_spill]] %s2044_s27  ;;  %s1611_s15 = sadd.s32 4294967294, %s2064_s13  }
  0x23   : > { %2510 = sst [smem:[#allocation20_spill]] %s2056_s30  ;;  %s45_s16 = sadd.s32 1, %s2056_s30 }
  0x24   : > { %2511 = sst [smem:[#allocation21_spill]] %s2060_s12  ;;  %s48_s17 = sadd.s32 1, %s2060_s12 }
  0x25   : > { %2512 = sst [smem:[#allocation22_spill]] %s2064_s13  ;;  %p46_p10 = scmp.ge.s32.totalorder %s45_s16, 3 }
  0x26   : > { %s318_s18 = sadd.s32 1, %s2044_s27  ;;  %p328_p11 = scmp.ne.s32.totalorder %s2044_s27, %s2040_s26 }
  0x27   : > { %p329_p12 = scmp.eq.s32.totalorder %s1610_s14, 5  ;;  %s2538_s16 = smov (%p46_p10, %s45_s16), 0 }
  0x28   : > { %2513 = sst [smem:[#allocation23_spill]] %s2538_s16  ;;  %s2540_s17 = smov (!%p46_p10, %s48_s17), %s2060_s12 }
  0x29   : > { %p2196_p13 = por %p329_p12, %p328_p11  ;;  %p334_p0 = scmp.ne.s32.totalorder %s2040_s26, %s2036_s1 }
  0x2a   : > { %p50_p1 = scmp.ge.s32.totalorder %s2540_s17, 2  ;;  %p335_p2 = scmp.eq.s32.totalorder %s1611_s15, 5 }
  0x2b   : > { %p1618_p3 = scmp.ge.s32.totalorder %s2064_s13, 1  ;;  %p342_p4 = scmp.lt.s32.totalorder %s2064_s13, 7 }
  0x2c   : > { %s2542_s17 = smov (%p50_p1, %s2540_s17), 0  ;;  %p2206_p5 = por %p335_p2, %p334_p0 }
  0x2d   : > { %2515 = sst [smem:[#allocation24_spill]] %s2542_s17  ;;  %p2210_p6 = pnand %p1618_p3, %p342_p4 }
  0x2e   : > { %s2516_s20 = scalar_select %p2206_p5, 1, 0 }
  0x2f   : > { %s315_s22 = ssub.s32 %s2060_s12, %s2542_s17  ;;  %p1770_p8 = pneg %p2210_p6 }
  0x30   : > { %2517 = sst [smem:[#allocation25_spill]] %s2516_s20  ;;  %p316_p7 = scmp.eq.s32.totalorder %s315_s22, 0 }
  0x31   : > { %p2218_p9 = scmp.eq.s32.totalorder %s1610_s14, 0  ;;  %s2068_s25 = smov [#allocation8]  }
  0x32   : > { %s2223_s24 = scalar_select %p316_p7, %s2044_s27, %s318_s18  }
  0x33   : > { %s360_s0 = sshll.u32 %s2068_s25, 4  ;;  %p2227_p10 = pnand %p2218_p9, %p1770_p8  ;;  %s361_s0 = int_to_ptr.vmem [resolvable:$true] %s360_s0 }
  0x34   : > { %2520 = sst [smem:[#allocation26_spill]] %s2223_s24  ;;  %s1921_s22 = scalar_lea.vmem %s361_s0, 8192 }
  0x35   : > { %p1912_p11 = pneg %p2227_p10  ;;  %p1922_p12 = scmp.ne.s32.totalorder %s361_s0, %s1921_s22 }
  0x36   : > { %p1929_p2 = scmp.lt.s32.totalorder %s361_s0, %s361_s0  ;;  %p1930_p3 = scmp.lt.s32.totalorder %s1921_s22, %s1921_s22 }
  0x37   : > { %p1924_p0 = pnand %p1922_p12, %p1912_p11 }
  0x38   : > { %p1931_p4 = por %p1930_p3, %p1929_p2 }
  0x39   : > { %p1925_p1 = pneg %p1924_p0 }
  0x3b   : > { %p1932_p7 = pnand %p1931_p4, %p1925_p1 }
  0x3d   : > { %1935 = shalt.err (!%p1932_p7)
}
  0x3e   : > { %s2069_s14 = smov 512   ;;  %s2070_s18 = smov 32  }
  0x3f   : > { %s2522_s8 = sld [smem:[#allocation27_spill]]  ;;  %s2071_s16 = smov [#allocation11]  }
  0x40   : > { %s373_s12 = sshll.u32 %s2071_s16, 4  ;;  %s374_s12 = int_to_ptr.vmem [resolvable:$true] %s373_s12 }
  0x41   : > { %s1947_s30 = scalar_lea.vmem %s374_s12, 8192  ;;  %p1955_p1 = scmp.lt.s32.totalorder %s374_s12, %s374_s12 }
  0x42   : > { %p1948_p8 = scmp.ne.s32.totalorder %s374_s12, %s1947_s30  ;;  %p1956_p2 = scmp.lt.s32.totalorder %s1947_s30, %s1947_s30 }
  0x44   : > { %p1950_p12 = pnand %p1948_p8, %p1912_p11  ;;  %p1957_p3 = por %p1956_p2, %p1955_p1 }
  0x45   : > { %1773 = dma.hbm_to_vmem [thread:$0]  (!%p2227_p10), %s2522_s8, 8192, %s361_s0, [#allocation9], %s2069_s14, %s2069_s14, %s2070_s18  }
  0x46   : > { %p1951_p0 = pneg %p1950_p12 }
  0x48   : > { %p1958_p4 = pnand %p1957_p3, %p1951_p0 }
  0x4a   : > { %1961 = shalt.err (!%p1958_p4)
}
  0x4b   : > { %s2523_s9 = sld [smem:[#allocation28_spill]] }
  0x4d   : > { %474 = sbr.rel (%p2210_p6) target bundleno = 1078 (0x436), region = 56 }
  0x51   : > { %1776 = dma.hbm_to_vmem [thread:$0]  (!%p2227_p10), %s2523_s9, 8192, %s374_s12, [#allocation12], %s2069_s14, %s2069_s14, %s2070_s18  }
  0x52   : > { %2023 = dma.done.wait (%p2218_p9), [#allocation9], 8192  }
  0x53   : > { %2025 = vsyncadd (%p2218_p9), [#allocation9], 4294959104 }
  0x54   : > { %2027 = dma.done.wait (%p2218_p9), [#allocation12], 8192  }
  0x55   : > { %2029 = vsyncadd (%p2218_p9), [#allocation12], 4294959104  ;;  %s2500_s30 = sand.u32 1, %s2040_s26   ;;  %s552_s16 = sld [smem:[#allocation7 + %s2052_s29]] }
  0x56   : > { %s2262_s12 = sshll.u32 %s2500_s30, 3  ;;  %s551_s17 = sld [smem:[#allocation6 + %s2052_s29]] }
  0x57   : > { %s573_s21 = sld [smem:[#allocation7 + %s2052_s29]]  ;;  %p617_p12 = scmp.lt.s32.totalorder %s2052_s29, 1 }
  0x58   : > { %s572_s24 = sld [smem:[#allocation6 + %s2052_s29]]  ;;  %p1632_p3 = scmp.ne.s32.totalorder %s2048_s28, 0 }
  0x59   : > { %s594_s23 = sld [smem:[#allocation7 + %s2052_s29]] }
  0x5a   : > { %s593_s18 = sld [smem:[#allocation6 + %s2052_s29]] }
  0x5b   : > { %p553_p6 = scmp.gt.s32.totalorder %s552_s16, 1 }
  0x5c   : > { %s557_s0 = sadd.s32 %s2048_s28, %s551_s17 }
  0x5d   : > { %s2544_s16 = smov (!%p553_p6, %s552_s16), 1  ;;  %p574_p9 = scmp.gt.s32.totalorder %s573_s21, 1 }
  0x5e   : > { %s555_s15 = sadd.s32 %s2544_s16, %s551_s17  ;;  %s578_s25 = sadd.s32 %s2048_s28, %s572_s24 }
  0x5f   : > { %s1626_s14 = sadd.s32 4294967295, %s555_s15  ;;  %s2546_s21 = smov (!%p574_p9, %s573_s21), 1 }
  0x60   : > { %p558_p10 = scmp.lt.s32.totalorder %s557_s0, %s1626_s14  ;;  %s576_s22 = sadd.s32 %s2546_s21, %s572_s24 }
  0x61   : > { %s1627_s30 = sadd.s32 4294967295, %s576_s22  ;;  %p595_p8 = scmp.gt.s32.totalorder %s594_s23, 1 }
  0x62   : > { %s2548_s0 = smov (!%p558_p10, %s557_s0), %s1626_s14  ;;  %p579_p7 = scmp.lt.s32.totalorder %s578_s25, %s1627_s30 }
  0x63   : > { %p560_p11 = scmp.lt.s32.totalorder %s2548_s0, 2  ;;  %s599_s17 = sadd.s32 %s2048_s28, %s593_s18 }
  0x64   : > { %s2552_s25 = smov (!%p579_p7, %s578_s25), %s1627_s30  ;;  %s2554_s23 = smov (!%p595_p8, %s594_s23), 1 }
  0x65   : > { %s2550_s0 = smov (!%p560_p11, %s2548_s0), 2  ;;  %p581_p0 = scmp.lt.s32.totalorder %s2552_s25, 2 }
  0x66   : > { %s597_s21 = sadd.s32 %s2554_s23, %s593_s18  ;;  %s550_s24 = scalar_lea.vmem [#allocation13], %s2262_s12 }
  0x67   : > { %s2556_s25 = smov (!%p581_p0, %s2552_s25), 2  ;;  %s1628_s22 = sadd.s32 4294967295, %s597_s21 }
  0x68   : > { %s583_s14 = scalar_lea.vmem %s2487_s3, %s2556_s25  ;;  %p600_p1 = scmp.lt.s32.totalorder %s599_s17, %s1628_s22 }
  0x69   : > { %s618_s30 = scalar_select %p617_p12, %s2052_s29, 1 }
  0x6a   : > { %s2558_s17 = smov (!%p600_p1, %s599_s17), %s1628_s22 }
  0x6b   : > { %s1631_s27 = sshll.u32 %s618_s30, 3  ;;  %s1629_s8 = sshll.u32 %s2558_s17, 4 }
  0x6c   : > { %s2290_s20 = scalar_lea.vmem %s2489_s5, %s1631_s27  ;;  %p603_p2 = scmp.lt.s32.totalorder %s1629_s8, 47 }
  0x6d   : > { %624 = sbr.rel (%p1632_p3) target bundleno = 117 (0x75), region = 68 }
  0x6e   : > { %s2560_s8 = smov (!%p603_p2, %s1629_s8), 47 }
  0x6f   : > { %s1630_s1 = sshll.u32 %s2560_s8, 3 }
  0x70   : > { %s2295_s18 = scalar_lea.vmem %s2488_s4, %s1630_s1 }
  0x72   : > { %vm625_vm0 = vcmask 7168   ;;  %v2072_v0 = vmov -40.0   ;;  %v2073_v1 = vmov 0.0  }
  0x73   : > { %626 = vst.msk [vmem:[#allocation2] sm:$0xff] %vm625_vm0, %v2072_v0  ;;  %627 = vst.msk [vmem:[#allocation3] sm:$0xff] %vm625_vm0, %v2073_v1 }
  0x74   : > { %628 = vst [vmem:[#allocation4] sm:$0xff] %v2073_v1 }
  0x75 PF: > { %s629_s27 = sld [smem:[#allocation7 + %s2052_s29]] }
  0x7b   : > { %p1633_p4 = scmp.ge.s32.totalorder %s2048_s28, %s629_s27 }
  0x7c   : > { %s1651_s21 = sshll.u32 (!%p1633_p4), %s2052_s29, 3  ;;  %s2524_s30 = scalar_lea.vmem (!%p1633_p4), %s2486_s2, %s2550_s0 }
  0x7d   : > { %633 = sbr.rel (%p1633_p4) target bundleno = 619 (0x26b), region = 72 }
  0x82   : > { %v651_v2 = vld [vmem:[%s2490_s6 + $0x8] sm:$0xff]  ;;  %v650_v3 = vld [vmem:[%s2490_s6] sm:$0xff]  ;;  %vm659_vm1 = vcmask 130048   ;;  %v854_v5 = vlaneseq  ;;  %v856_v6 = vstv %s1651_s21  ;;  %v636_v9 = vld [vmem:[%s2295_s18 + $0x10] sm:$0xff]  ;;  %v2074_v28 = vmov 0  }
  0x83   : > { %v634_v4 = vld [vmem:[%s2295_s18] sm:$0xff]  ;;  %1697 = vmatprep.subr.mxu0 %v651_v2  ;;  %v635_v7 = vld [vmem:[%s2295_s18 + $0x8] sm:$0xff]  ;;  %v637_v15 = vld [vmem:[%s2295_s18 + $0x18] sm:$0xff]  ;;  %1863 = vset.pattern.permute.xlu0 %v2074_v28  ;;  %v2075_v30 = vmov 0.0   ;;  %vm902_vm3 = vcmask 7168   ;;  %vm2076_vm4 = vmmov 0  }
  0x84   : > { %1701 = vmatprep.mubr.msk.f32.mxu0 %vm659_vm1, %v634_v4  ;;  %1698 = vmatpush3.msra.mxu0 %v651_v2  ;;  %v2311_v8 = vshrl.u32 %v854_v5, 7  ;;  %v2319_v10 = vld [vmem:[%s2524_s30] ss:$0 sm:$0xff]  ;;  %v639_v18 = vld [vmem:[%s2295_s18 + $0x28] sm:$0xff]  ;;  %v640_v19 = vld [vmem:[%s2295_s18 + $0x30] sm:$0xff] }
  0x85   : > { %1699 = vmatprep.subr.mxu0 %v650_v3  ;;  %v2326_v11 = vld [vmem:[%s583_s14] sm:$0x1]  ;;  %v641_v20 = vld [vmem:[%s2295_s18 + $0x38] sm:$0xff]  ;;  %v643_v22 = vld [vmem:[%s2295_s18 + $0x48] sm:$0xff]  ;;  %1864 = vset.pattern.permute.xlu1 %v2074_v28 }
  0x86   : > { %1700 = vmatpush3.msra.mxu0 %v650_v3  ;;  %v2329_v12 = vadd.s32 %v856_v6, %v2311_v8  ;;  %v868_v13 = vsub.s32 0, %v2311_v8  ;;  %v638_v16 = vld [vmem:[%s2295_s18 + $0x20] sm:$0xff]  ;;  %v644_v23 = vld [vmem:[%s2295_s18 + $0x50] sm:$0xff]  ;;  %v645_v24 = vld [vmem:[%s2295_s18 + $0x58] sm:$0xff]  ;;  %1725 = vmatprep.subr.mxu1 %v2075_v30 }
  0x87   : > { %1702 = vmatmul.mubr.msk.f32.vlgmr.msra.gmra.mxu0 %vm659_vm1, %v635_v7  ;;  %v642_v21 = vld [vmem:[%s2295_s18 + $0x40] sm:$0xff]  ;;  %v647_v26 = vld [vmem:[%s2295_s18 + $0x68] sm:$0xff]  ;;  %v648_v27 = vld [vmem:[%s2295_s18 + $0x70] sm:$0xff]  ;;  %1757 = vmatprep.mubr.msk.f32.mxu1 %vm2076_vm4, %v2075_v30  ;;  %v879_v7 = vmul.f32 1.442695, %v2326_v11 }
  0x88   : > { %1704 = vmatprep.mubr.msk.f32.mxu0 %vm659_vm1, %v636_v9  ;;  %vm863_vm2 = vcmp.eq.s32.totalorder %v2319_v10, %v2329_v12  ;;  %v869_v14 = vrot.slane %v2326_v11, %v868_v13  ;;  %v646_v25 = vld [vmem:[%s2295_s18 + $0x60] sm:$0xff]  ;;  %v649_v29 = vld [vmem:[%s2295_s18 + $0x78] sm:$0xff]  ;;  %v897_v8 = vld [vmem:[#allocation3] sm:$0xff] }
  0x89   : > { %v2369_v31 = vld [vmem:[#allocation2] sm:$0xff] }
  0x8a   : > { %v871_v17 = vsel %vm863_vm2, %v869_v14, -1e+30  ;;  %v1634_v51 = vld [vmem:[%s2491_s7] ss:$0 sm:$0xff] }
  0x8b   : > { %873 = vmax.xlane.f32.xlu0 %v871_v17  ;;  %1705 = vmatmul.mubr.msk.f32.gmra.mxu0 %vm659_vm1, %v637_v15 }
  0x8c   : > { %1707 = vmatprep.mubr.msk.f32.mxu0 %vm659_vm1, %v638_v16 }
  0x8f   : > { %1708 = vmatmul.mubr.msk.f32.gmra.mxu0 %vm659_vm1, %v639_v18 }
  0x90   : > { %1710 = vmatprep.mubr.msk.f32.mxu0 %vm659_vm1, %v640_v19 }
  0x93   : > { %1711 = vmatmul.mubr.msk.f32.gmra.mxu0 %vm659_vm1, %v641_v20 }
  0x94   : > { %1713 = vmatprep.mubr.msk.f32.mxu0 %vm659_vm1, %v642_v21  ;;  %v904_v21 = vld [vmem:[#allocation4] sm:$0xff] }
  0x97   : > { %1714 = vmatmul.mubr.msk.f32.gmra.mxu0 %vm659_vm1, %v643_v22 }
  0x98   : > { %1716 = vmatprep.mubr.msk.f32.mxu0 %vm659_vm1, %v644_v23 }
  0x9b   : > { %1717 = vmatmul.mubr.msk.f32.gmra.mxu0 %vm659_vm1, %v645_v24 }
  0x9c   : > { %1719 = vmatprep.mubr.msk.f32.mxu0 %vm659_vm1, %v646_v25 }
  0x9f   : > { %1720 = vmatmul.mubr.msk.f32.gmra.mxu0 %vm659_vm1, %v647_v26 }
  0xa0   : > { %1722 = vmatprep.mubr.msk.f32.mxu0 %vm659_vm1, %v648_v27 }
  0xa3   : > { %1723 = vmatmul.mubr.msk.f32.gmra.mxu0 %vm659_vm1, %v649_v29 }
 0x114   : > { %v874_v32 = vpop.xlane.xlu0 %873 }
 0x115   : > { %v2372_v33 = vmax.f32 %v2369_v31, %v874_v32 }
 0x117   : > { %v876_v34 = vsub.f32 %v2369_v31, %v2372_v33  ;;  %v881_v35 = vsub.f32 0.0, %v2372_v33  ;;  %983 = vst.msk [vmem:[#allocation2] sm:$0xff] %vm902_vm3, %v2372_v33 }
 0x119   : > { %v882_v36 = vmul.f32 1.442695, %v881_v35  ;;  %v877_v17 = vmul.f32 1.442695, %v876_v34 }
 0x11b   : > { %1865 = vpow2.f32 %v882_v36 }
 0x11c   : > { %1867 = vpow2.f32 %v879_v7 }
 0x11d   : > { %1869 = vpow2.f32 %v877_v17 }
 0x128   : > { %v1866_v37 = vpop.eup %1865 }
 0x129   : > { %892 = vperm.xlu0 %1863, %v1866_v37   ;;  %v1868_v9 = vpop.eup %1867 }
 0x12a   : > { %v888_v14 = vrot.slane %v1868_v9, %v868_v13  ;;  %v1870_v11 = vpop.eup %1869 }
 0x12b   : > { %v898_v13 = vmul.f32 %v1870_v11, %v897_v8 }
 0x147   : > { %v1703_v38 = vpop.f32.mrf.mxu0 }
 0x148   : > { %v780_v5 = vadd.f32 %v1703_v38, %v1634_v51 }
 0x149   : > { %v774_v39 = vpop.f32.mrf.mxu0 }
 0x14a   : > { %v775_v6 = vadd.f32 %v1634_v51, %v774_v39 }
 0x14b   : > { %v1706_v40 = vpop.f32.mrf.mxu0 }
 0x14c   : > { %v790_v3 = vadd.f32 %v1706_v40, %v1634_v51 }
 0x14d   : > { %v784_v41 = vpop.f32.mrf.mxu0 }
 0x14e   : > { %v785_v4 = vadd.f32 %v1634_v51, %v784_v41 }
 0x14f   : > { %v1709_v42 = vpop.f32.mrf.mxu0 }
 0x150   : > { %v800_v1 = vadd.f32 %v1709_v42, %v1634_v51 }
 0x151   : > { %v794_v43 = vpop.f32.mrf.mxu0 }
 0x152   : > { %v795_v2 = vadd.f32 %v1634_v51, %v794_v43 }
 0x153   : > { %v1712_v44 = vpop.f32.mrf.mxu0 }
 0x154   : > { %v810_v63 = vadd.f32 %v1712_v44, %v1634_v51 }
 0x155   : > { %v804_v45 = vpop.f32.mrf.mxu0 }
 0x156   : > { %v805_v0 = vadd.f32 %v1634_v51, %v804_v45 }
 0x157   : > { %v1715_v46 = vpop.f32.mrf.mxu0 }
 0x158   : > { %v820_v61 = vadd.f32 %v1715_v46, %v1634_v51 }
 0x159   : > { %v814_v47 = vpop.f32.mrf.mxu0 }
 0x15a   : > { %v815_v62 = vadd.f32 %v1634_v51, %v814_v47 }
 0x15b   : > { %v1718_v48 = vpop.f32.mrf.mxu0 }
 0x15c   : > { %v830_v59 = vadd.f32 %v1718_v48, %v1634_v51 }
 0x15d   : > { %v824_v49 = vpop.f32.mrf.mxu0 }
 0x15e   : > { %v825_v60 = vadd.f32 %v1634_v51, %v824_v49 }
 0x15f   : > { %v1721_v50 = vpop.f32.mrf.mxu0 }
 0x160   : > { %v840_v56 = vadd.f32 %v1721_v50, %v1634_v51 }
 0x161   : > { %v834_v52 = vpop.f32.mrf.mxu0 }
 0x162   : > { %v835_v58 = vadd.f32 %v1634_v51, %v834_v52 }
 0x163   : > { %v1724_v53 = vpop.f32.mrf.mxu0 }
 0x164   : > { %v850_v54 = vadd.f32 %v1724_v53, %v1634_v51 }
 0x165   : > { %v844_v55 = vpop.f32.mrf.mxu0 }
 0x166   : > { %v845_v57 = vadd.f32 %v1634_v51, %v844_v55  ;;  %1726 = vmatpush3.msra.mxu1 %v850_v54 }
 0x167   : > { %1727 = vmatprep.subr.mxu1 %v2075_v30 }
 0x168   : > { %1728 = vmatpush3.msra.mxu1 %v845_v57 }
 0x169   : > { %1729 = vmatprep.subr.mxu1 %v2075_v30 }
 0x16a   : > { %1730 = vmatpush3.msra.mxu1 %v840_v56 }
 0x16b   : > { %1731 = vmatprep.subr.mxu1 %v2075_v30 }
 0x16c   : > { %1732 = vmatpush3.msra.mxu1 %v835_v58 }
 0x16d   : > { %1733 = vmatprep.subr.mxu1 %v2075_v30 }
 0x16e   : > { %1734 = vmatpush3.msra.mxu1 %v830_v59 }
 0x16f   : > { %1735 = vmatprep.subr.mxu1 %v2075_v30 }
 0x170   : > { %1736 = vmatpush3.msra.mxu1 %v825_v60 }
 0x171   : > { %1737 = vmatprep.subr.mxu1 %v2075_v30 }
 0x172   : > { %1738 = vmatpush3.msra.mxu1 %v820_v61 }
 0x173   : > { %1739 = vmatprep.subr.mxu1 %v2075_v30 }
 0x174   : > { %1740 = vmatpush3.msra.mxu1 %v815_v62 }
 0x175   : > { %1741 = vmatprep.subr.mxu1 %v2075_v30 }
 0x176   : > { %1742 = vmatpush3.msra.mxu1 %v810_v63 }
 0x177   : > { %1743 = vmatprep.subr.mxu1 %v2075_v30 }
 0x178   : > { %1744 = vmatpush3.msra.mxu1 %v805_v0 }
 0x179   : > { %1745 = vmatprep.subr.mxu1 %v2075_v30 }
 0x17a   : > { %1746 = vmatpush3.msra.mxu1 %v800_v1 }
 0x17b   : > { %1747 = vmatprep.subr.mxu1 %v2075_v30 }
 0x17c   : > { %1748 = vmatpush3.msra.mxu1 %v795_v2 }
 0x17d   : > { %1749 = vmatprep.subr.mxu1 %v2075_v30 }
 0x17e   : > { %1750 = vmatpush3.msra.mxu1 %v790_v3 }
 0x17f   : > { %1751 = vmatprep.subr.mxu1 %v2075_v30 }
 0x180   : > { %1752 = vmatpush3.msra.mxu1 %v785_v4 }
 0x181   : > { %1753 = vmatprep.subr.mxu1 %v2075_v30 }
 0x182   : > { %1754 = vmatpush3.msra.mxu1 %v780_v5 }
 0x183   : > { %1755 = vmatprep.subr.mxu1 %v2075_v30 }
 0x184   : > { %1756 = vmatpush3.msra.mxu1 %v775_v6 }
 0x1a4   : > { %v893_v15 = vpop.permute.xlu0 %892 }
 0x1a5   : > { %v895_v16 = vmul.f32 %v893_v15, %v888_v14 }
 0x1a7   : > { %1758 = vmatmul.mubr.msk.f32.vlgmr.msra.gmra.mxu1 %vm863_vm2, %v895_v16  ;;  %v896_v18 = vsel %vm863_vm2, %v895_v16, 0.0 }
 0x1a8   : > { %899 = vadd.xlane.f32.xlu1 %v896_v18 }
 0x1b9   : > { %907 = vperm.xlu1 %1864, %v1870_v11  }
 0x231   : > { %v900_v19 = vpop.xlane.xlu1 %899 }
 0x232   : > { %v901_v20 = vadd.f32 %v900_v19, %v898_v13 }
 0x234   : > { %903 = vst.msk [vmem:[#allocation3] sm:$0xff] %vm902_vm3, %v901_v20 }
 0x235   : > { %v908_v22 = vpop.permute.xlu1 %907 }
 0x236   : > { %v910_v23 = vmul.f32 %v908_v22, %v904_v21 }
 0x267   : > { %v977_v24 = vpop.f32.mrf.mxu1 }
 0x268   : > { %v981_v25 = vadd.f32 %v977_v24, %v910_v23 }
 0x269   : > { %v1759_v26 = vpop.f32.mrf.mxu1 }
 0x26a   : > { %982 = vst [vmem:[#allocation4] sm:$0xff] %v981_v25 }
 0x26b PF: > { %p1654_p6 = scmp.ne.s32.totalorder %s2048_s28, 2 }
 0x26d   : > { %987 = sbr.rel (%p1654_p6) target bundleno = 1054 (0x41e), region = 76 }
 0x272   : > { %v2412_v10 = vld [vmem:[#allocation3] sm:$0xff]  ;;  %v1140_v12 = vld [vmem:[#allocation11 + $0x1e8] sm:$0xff]  ;;  %v1139_v27 = vld [vmem:[#allocation11 + $0x1e0] sm:$0xff]  ;;  %v2077_v28 = vmov 0  }
 0x273   : > { %1871 = vset.pattern.permute.xlu0 %v2077_v28  ;;  %v990_v29 = vmax.f32 %v2412_v10, 1e-30  ;;  %1143 = vmatprep.subr.mxu0 %v1140_v12  ;;  %v1142_v30 = vld [vmem:[#allocation11 + $0x1f8] sm:$0xff]  ;;  %v1136_v31 = vld [vmem:[#allocation11 + $0x1c8] sm:$0xff]  ;;  %v1141_v32 = vld [vmem:[#allocation11 + $0x1f0] sm:$0xff]  ;;  %vm995_vm5 = vcmp.gt.f32.partialorder %v2412_v10, 0.0 }
 0x274   : > { %1144 = vmatpush1.msra.mxu0 %v1139_v27  ;;  %1214 = vmatprep.subr.mxu1 %v1142_v30  ;;  %v1135_v33 = vld [vmem:[#allocation11 + $0x1c0] sm:$0xff]  ;;  %v1138_v34 = vld [vmem:[#allocation11 + $0x1d8] sm:$0xff]  ;;  %v1132_v35 = vld [vmem:[#allocation11 + $0x1a8] sm:$0xff]  ;;  %v1003_v20 = vsel %vm995_vm5, 1, %v2077_v28 }
 0x275   : > { %1872 = vrcp.f32 %v990_v29  ;;  %1145 = vmatprep.subr.mxu0 %v1136_v31  ;;  %1215 = vmatpush1.msra.mxu1 %v1141_v32  ;;  %v1137_v36 = vld [vmem:[#allocation11 + $0x1d0] sm:$0xff]  ;;  %v1131_v37 = vld [vmem:[#allocation11 + $0x1a0] sm:$0xff]  ;;  %v1134_v38 = vld [vmem:[#allocation11 + $0x1b8] sm:$0xff] }
 0x276   : > { %1146 = vmatpush1.msra.mxu0 %v1135_v33  ;;  %1216 = vmatprep.subr.mxu1 %v1138_v34  ;;  %v1128_v39 = vld [vmem:[#allocation11 + $0x188] sm:$0xff]  ;;  %v1133_v40 = vld [vmem:[#allocation11 + $0x1b0] sm:$0xff]  ;;  %v1127_v41 = vld [vmem:[#allocation11 + $0x180] sm:$0xff]  ;;  %v2078_v34 = vmov 0.0  }
 0x277   : > { %1147 = vmatprep.subr.mxu0 %v1132_v35  ;;  %1217 = vmatpush1.msra.mxu1 %v1137_v36  ;;  %v1130_v42 = vld [vmem:[#allocation11 + $0x198] sm:$0xff]  ;;  %v1124_v43 = vld [vmem:[#allocation11 + $0x168] sm:$0xff]  ;;  %v1129_v44 = vld [vmem:[#allocation11 + $0x190] sm:$0xff] }
 0x278   : > { %1148 = vmatpush1.msra.mxu0 %v1131_v37  ;;  %1218 = vmatprep.subr.mxu1 %v1134_v38  ;;  %v1123_v45 = vld [vmem:[#allocation11 + $0x160] sm:$0xff]  ;;  %v1126_v46 = vld [vmem:[#allocation11 + $0x178] sm:$0xff]  ;;  %v1120_v47 = vld [vmem:[#allocation11 + $0x148] sm:$0xff] }
 0x279   : > { %1149 = vmatprep.subr.mxu0 %v1128_v39  ;;  %1219 = vmatpush1.msra.mxu1 %v1133_v40  ;;  %v1125_v48 = vld [vmem:[#allocation11 + $0x170] sm:$0xff]  ;;  %v1119_v49 = vld [vmem:[#allocation11 + $0x140] sm:$0xff]  ;;  %v1122_v50 = vld [vmem:[#allocation11 + $0x158] sm:$0xff] }
 0x27a   : > { %1150 = vmatpush1.msra.mxu0 %v1127_v41  ;;  %1220 = vmatprep.subr.mxu1 %v1130_v42  ;;  %v1116_v51 = vld [vmem:[#allocation11 + $0x128] sm:$0xff]  ;;  %v1121_v52 = vld [vmem:[#allocation11 + $0x150] sm:$0xff]  ;;  %v1115_v53 = vld [vmem:[#allocation11 + $0x120] sm:$0xff] }
 0x27b   : > { %1151 = vmatprep.subr.mxu0 %v1124_v43  ;;  %1221 = vmatpush1.msra.mxu1 %v1129_v44  ;;  %v1118_v54 = vld [vmem:[#allocation11 + $0x138] sm:$0xff]  ;;  %v1112_v55 = vld [vmem:[#allocation11 + $0x108] sm:$0xff]  ;;  %v1117_v56 = vld [vmem:[#allocation11 + $0x130] sm:$0xff] }
 0x27c   : > { %1152 = vmatpush1.msra.mxu0 %v1123_v45  ;;  %1222 = vmatprep.subr.mxu1 %v1126_v46  ;;  %v1111_v57 = vld [vmem:[#allocation11 + $0x100] sm:$0xff]  ;;  %v1114_v58 = vld [vmem:[#allocation11 + $0x118] sm:$0xff]  ;;  %v1108_v59 = vld [vmem:[#allocation11 + $0xe8] sm:$0xff] }
 0x27d   : > { %1153 = vmatprep.subr.mxu0 %v1120_v47  ;;  %1223 = vmatpush1.msra.mxu1 %v1125_v48  ;;  %v1113_v60 = vld [vmem:[#allocation11 + $0x110] sm:$0xff]  ;;  %v1107_v61 = vld [vmem:[#allocation11 + $0xe0] sm:$0xff]  ;;  %v1110_v62 = vld [vmem:[#allocation11 + $0xf8] sm:$0xff] }
 0x27e   : > { %1154 = vmatpush1.msra.mxu0 %v1119_v49  ;;  %1224 = vmatprep.subr.mxu1 %v1122_v50  ;;  %v1104_v0 = vld [vmem:[#allocation11 + $0xc8] sm:$0xff]  ;;  %v1109_v1 = vld [vmem:[#allocation11 + $0xf0] sm:$0xff]  ;;  %v1103_v3 = vld [vmem:[#allocation11 + $0xc0] sm:$0xff] }
 0x27f   : > { %1155 = vmatprep.subr.mxu0 %v1116_v51  ;;  %1225 = vmatpush1.msra.mxu1 %v1121_v52  ;;  %v1106_v4 = vld [vmem:[#allocation11 + $0xd8] sm:$0xff]  ;;  %v1100_v5 = vld [vmem:[#allocation11 + $0xa8] sm:$0xff]  ;;  %v1105_v6 = vld [vmem:[#allocation11 + $0xd0] sm:$0xff] }
 0x280   : > { %1156 = vmatpush1.msra.mxu0 %v1115_v53  ;;  %1226 = vmatprep.subr.mxu1 %v1118_v54  ;;  %v1099_v9 = vld [vmem:[#allocation11 + $0xa0] sm:$0xff]  ;;  %v1102_v14 = vld [vmem:[#allocation11 + $0xb8] sm:$0xff]  ;;  %v1096_v15 = vld [vmem:[#allocation11 + $0x88] sm:$0xff] }
 0x281   : > { %1157 = vmatprep.subr.mxu0 %v1112_v55  ;;  %1227 = vmatpush1.msra.mxu1 %v1117_v56  ;;  %v1101_v17 = vld [vmem:[#allocation11 + $0xb0] sm:$0xff]  ;;  %v1095_v18 = vld [vmem:[#allocation11 + $0x80] sm:$0xff]  ;;  %v1098_v11 = vld [vmem:[#allocation11 + $0x98] sm:$0xff] }
 0x282   : > { %v1873_v63 = vpop.eup %1872  ;;  %1158 = vmatpush1.msra.mxu0 %v1111_v57  ;;  %1228 = vmatprep.subr.mxu1 %v1114_v58  ;;  %v1092_v8 = vld [vmem:[#allocation11 + $0x68] sm:$0xff]  ;;  %v1097_v13 = vld [vmem:[#allocation11 + $0x90] sm:$0xff]  ;;  %v1091_v19 = vld [vmem:[#allocation11 + $0x60] sm:$0xff] }
 0x283   : > { %v992_v2 = vmul.f32 %v1873_v63, %v990_v29  ;;  %1159 = vmatprep.subr.mxu0 %v1108_v59  ;;  %1229 = vmatpush1.msra.mxu1 %v1113_v60  ;;  %v1094_v21 = vld [vmem:[#allocation11 + $0x78] sm:$0xff]  ;;  %v1088_v22 = vld [vmem:[#allocation11 + $0x48] sm:$0xff]  ;;  %v1093_v23 = vld [vmem:[#allocation11 + $0x70] sm:$0xff] }
 0x284   : > { %1160 = vmatpush1.msra.mxu0 %v1107_v61  ;;  %1230 = vmatprep.subr.mxu1 %v1110_v62  ;;  %v1087_v24 = vld [vmem:[#allocation11 + $0x40] sm:$0xff]  ;;  %v1090_v25 = vld [vmem:[#allocation11 + $0x58] sm:$0xff]  ;;  %v1084_v26 = vld [vmem:[#allocation11 + $0x28] sm:$0xff] }
 0x285   : > { %v993_v7 = vsub.f32 2.0, %v992_v2  ;;  %1161 = vmatprep.subr.mxu0 %v1104_v0  ;;  %1231 = vmatpush1.msra.mxu1 %v1109_v1  ;;  %v1089_v10 = vld [vmem:[#allocation11 + $0x50] sm:$0xff]  ;;  %v1083_v12 = vld [vmem:[#allocation11 + $0x20] sm:$0xff]  ;;  %v1086_v27 = vld [vmem:[#allocation11 + $0x38] sm:$0xff] }
 0x286   : > { %1162 = vmatpush1.msra.mxu0 %v1103_v3  ;;  %1232 = vmatprep.subr.mxu1 %v1106_v4  ;;  %v1080_v28 = vld [vmem:[#allocation11 + $0x8] sm:$0xff]  ;;  %v1085_v29 = vld [vmem:[#allocation11 + $0x30] sm:$0xff]  ;;  %v1079_v30 = vld [vmem:[#allocation11] sm:$0xff] }
 0x287   : > { %v994_v16 = vmul.f32 %v1873_v63, %v993_v7  ;;  %1163 = vmatprep.subr.mxu0 %v1100_v5  ;;  %1233 = vmatpush1.msra.mxu1 %v1105_v6  ;;  %v1082_v31 = vld [vmem:[#allocation11 + $0x18] sm:$0xff]  ;;  %v2423_v32 = vld [vmem:[%s2290_s20] sm:$0xff]  ;;  %v1081_v33 = vld [vmem:[#allocation11 + $0x10] sm:$0xff] }
 0x288   : > { %1164 = vmatpush1.msra.mxu0 %v1099_v9  ;;  %1234 = vmatprep.subr.mxu1 %v1102_v14  ;;  %v1076_v35 = vld [vmem:[#allocation8 + $0x1e8] sm:$0xff]  ;;  %v1078_v36 = vld [vmem:[#allocation8 + $0x1f8] sm:$0xff]  ;;  %v1075_v37 = vld [vmem:[#allocation8 + $0x1e0] sm:$0xff] }
 0x289   : > { %999 = vperm.xlu0 %1871, %v994_v16   ;;  %1165 = vmatprep.subr.mxu0 %v1096_v15  ;;  %v1077_v38 = vld [vmem:[#allocation8 + $0x1f0] sm:$0xff]  ;;  %v1072_v39 = vld [vmem:[#allocation8 + $0x1c8] sm:$0xff]  ;;  %v1074_v40 = vld [vmem:[#allocation8 + $0x1d8] sm:$0xff] }
 0x28a   : > { %1235 = vmatpush1.msra.mxu1 %v1101_v17  ;;  %1166 = vmatpush1.msra.mxu0 %v1095_v18  ;;  %v1071_v41 = vld [vmem:[#allocation8 + $0x1c0] sm:$0xff]  ;;  %v1073_v42 = vld [vmem:[#allocation8 + $0x1d0] sm:$0xff]  ;;  %v1068_v43 = vld [vmem:[#allocation8 + $0x1a8] sm:$0xff] }
 0x28b   : > { %1236 = vmatprep.subr.mxu1 %v1098_v11  ;;  %1167 = vmatprep.subr.mxu0 %v1092_v8  ;;  %v1070_v44 = vld [vmem:[#allocation8 + $0x1b8] sm:$0xff]  ;;  %v1067_v45 = vld [vmem:[#allocation8 + $0x1a0] sm:$0xff]  ;;  %v1069_v46 = vld [vmem:[#allocation8 + $0x1b0] sm:$0xff] }
 0x28c   : > { %1237 = vmatpush1.msra.mxu1 %v1097_v13  ;;  %1168 = vmatpush1.msra.mxu0 %v1091_v19  ;;  %v1064_v47 = vld [vmem:[#allocation8 + $0x188] sm:$0xff]  ;;  %v1066_v48 = vld [vmem:[#allocation8 + $0x198] sm:$0xff]  ;;  %v1063_v49 = vld [vmem:[#allocation8 + $0x180] sm:$0xff] }
 0x28d   : > { %1005 = vperm.xlu0 %1871, %v1003_v20   ;;  %1238 = vmatprep.subr.mxu1 %v1094_v21  ;;  %v1065_v50 = vld [vmem:[#allocation8 + $0x190] sm:$0xff]  ;;  %v1060_v51 = vld [vmem:[#allocation8 + $0x168] sm:$0xff]  ;;  %v1062_v52 = vld [vmem:[#allocation8 + $0x178] sm:$0xff] }
 0x28e   : > { %1169 = vmatprep.subr.mxu0 %v1088_v22  ;;  %1239 = vmatpush1.msra.mxu1 %v1093_v23  ;;  %v1059_v53 = vld [vmem:[#allocation8 + $0x160] sm:$0xff]  ;;  %v1061_v54 = vld [vmem:[#allocation8 + $0x170] sm:$0xff]  ;;  %v1056_v55 = vld [vmem:[#allocation8 + $0x148] sm:$0xff] }
 0x28f   : > { %1170 = vmatpush1.msra.mxu0 %v1087_v24  ;;  %1240 = vmatprep.subr.mxu1 %v1090_v25  ;;  %v1058_v56 = vld [vmem:[#allocation8 + $0x158] sm:$0xff]  ;;  %v1055_v57 = vld [vmem:[#allocation8 + $0x140] sm:$0xff]  ;;  %v1057_v58 = vld [vmem:[#allocation8 + $0x150] sm:$0xff] }
 0x290   : > { %1171 = vmatprep.subr.mxu0 %v1084_v26  ;;  %1241 = vmatpush1.msra.mxu1 %v1089_v10  ;;  %v1052_v59 = vld [vmem:[#allocation8 + $0x128] sm:$0xff]  ;;  %v1054_v60 = vld [vmem:[#allocation8 + $0x138] sm:$0xff]  ;;  %v1051_v61 = vld [vmem:[#allocation8 + $0x120] sm:$0xff] }
 0x291   : > { %1172 = vmatpush1.msra.mxu0 %v1083_v12  ;;  %1242 = vmatprep.subr.mxu1 %v1086_v27  ;;  %v1053_v62 = vld [vmem:[#allocation8 + $0x130] sm:$0xff]  ;;  %v1048_v63 = vld [vmem:[#allocation8 + $0x108] sm:$0xff]  ;;  %v1050_v0 = vld [vmem:[#allocation8 + $0x118] sm:$0xff] }
 0x292   : > { %1173 = vmatprep.subr.mxu0 %v1080_v28  ;;  %1243 = vmatpush1.msra.mxu1 %v1085_v29  ;;  %v1047_v1 = vld [vmem:[#allocation8 + $0x100] sm:$0xff]  ;;  %v1049_v2 = vld [vmem:[#allocation8 + $0x110] sm:$0xff]  ;;  %v1044_v3 = vld [vmem:[#allocation8 + $0xe8] sm:$0xff] }
 0x293   : > { %1174 = vmatpush1.msra.mxu0 %v1079_v30  ;;  %1207 = vmatprep.mubr.f32.mxu0 %v2078_v34  ;;  %v1046_v4 = vld [vmem:[#allocation8 + $0xf8] sm:$0xff]  ;;  %v1043_v5 = vld [vmem:[#allocation8 + $0xe0] sm:$0xff]  ;;  %v1045_v6 = vld [vmem:[#allocation8 + $0xf0] sm:$0xff] }
 0x294   : > { %1244 = vmatprep.subr.mxu1 %v1082_v31  ;;  %1208 = vmatmul.mubr.f32.vlgmr.msra.gmra.mxu0 %v2423_v32  ;;  %v1040_v7 = vld [vmem:[#allocation8 + $0xc8] sm:$0xff]  ;;  %v1042_v9 = vld [vmem:[#allocation8 + $0xd8] sm:$0xff]  ;;  %v1039_v14 = vld [vmem:[#allocation8 + $0xc0] sm:$0xff] }
 0x295   : > { %1245 = vmatpush1.msra.mxu1 %v1081_v33  ;;  %1278 = vmatprep.mubr.f32.mxu1 %v2078_v34  ;;  %v1041_v15 = vld [vmem:[#allocation8 + $0xd0] sm:$0xff]  ;;  %v1036_v16 = vld [vmem:[#allocation8 + $0xa8] sm:$0xff]  ;;  %v1038_v17 = vld [vmem:[#allocation8 + $0xb8] sm:$0xff] }
 0x296   : > { %1285 = vmatprep.subr.mxu0 %v1076_v35  ;;  %1356 = vmatprep.subr.mxu1 %v1078_v36  ;;  %v1035_v18 = vld [vmem:[#allocation8 + $0xa0] sm:$0xff]  ;;  %v1037_v11 = vld [vmem:[#allocation8 + $0xb0] sm:$0xff]  ;;  %v1032_v8 = vld [vmem:[#allocation8 + $0x88] sm:$0xff] }
 0x297   : > { %1279 = vmatmul.mubr.f32.vlgmr.msra.gmra.mxu1 %v2423_v32  ;;  %1286 = vmatpush1.msra.mxu0 %v1075_v37  ;;  %v1034_v13 = vld [vmem:[#allocation8 + $0x98] sm:$0xff]  ;;  %v1031_v19 = vld [vmem:[#allocation8 + $0x80] sm:$0xff]  ;;  %v1033_v20 = vld [vmem:[#allocation8 + $0x90] sm:$0xff] }
 0x298   : > { %1357 = vmatpush1.msra.mxu1 %v1077_v38  ;;  %1287 = vmatprep.subr.mxu0 %v1072_v39  ;;  %v1028_v21 = vld [vmem:[#allocation8 + $0x68] sm:$0xff]  ;;  %v1030_v22 = vld [vmem:[#allocation8 + $0x78] sm:$0xff]  ;;  %v1027_v23 = vld [vmem:[#allocation8 + $0x60] sm:$0xff] }
 0x299   : > { %1358 = vmatprep.subr.mxu1 %v1074_v40  ;;  %1288 = vmatpush1.msra.mxu0 %v1071_v41  ;;  %v1029_v24 = vld [vmem:[#allocation8 + $0x70] sm:$0xff]  ;;  %v1024_v25 = vld [vmem:[#allocation8 + $0x48] sm:$0xff]  ;;  %v1026_v26 = vld [vmem:[#allocation8 + $0x58] sm:$0xff] }
 0x29a   : > { %1359 = vmatpush1.msra.mxu1 %v1073_v42  ;;  %1289 = vmatprep.subr.mxu0 %v1068_v43  ;;  %v1023_v10 = vld [vmem:[#allocation8 + $0x40] sm:$0xff]  ;;  %v1025_v12 = vld [vmem:[#allocation8 + $0x50] sm:$0xff]  ;;  %v1020_v27 = vld [vmem:[#allocation8 + $0x28] sm:$0xff] }
 0x29b   : > { %1360 = vmatprep.subr.mxu1 %v1070_v44  ;;  %1290 = vmatpush1.msra.mxu0 %v1067_v45  ;;  %v1022_v28 = vld [vmem:[#allocation8 + $0x38] sm:$0xff]  ;;  %v1019_v29 = vld [vmem:[#allocation8 + $0x20] sm:$0xff]  ;;  %v1021_v30 = vld [vmem:[#allocation8 + $0x30] sm:$0xff] }
 0x29c   : > { %1361 = vmatpush1.msra.mxu1 %v1069_v46  ;;  %1291 = vmatprep.subr.mxu0 %v1064_v47  ;;  %v1016_v31 = vld [vmem:[#allocation8 + $0x8] sm:$0xff]  ;;  %v1018_v33 = vld [vmem:[#allocation8 + $0x18] sm:$0xff]  ;;  %v1015_v35 = vld [vmem:[#allocation8] sm:$0xff]  ;;  %v1429_v47 = vlaneseq }
 0x29d   : > { %1362 = vmatprep.subr.mxu1 %v1066_v48  ;;  %1292 = vmatpush1.msra.mxu0 %v1063_v49  ;;  %v1017_v36 = vld [vmem:[#allocation8 + $0x10] sm:$0xff]  ;;  %v996_v38 = vld [vmem:[#allocation4] sm:$0xff] }
 0x29e   : > { %1363 = vmatpush1.msra.mxu1 %v1065_v50  ;;  %1293 = vmatprep.subr.mxu0 %v1060_v51  ;;  %v1430_v48 = vshrl.u32 %v1429_v47, 7 }
 0x29f   : > { %1364 = vmatprep.subr.mxu1 %v1062_v52  ;;  %1294 = vmatpush1.msra.mxu0 %v1059_v53 }
 0x2a0   : > { %1365 = vmatpush1.msra.mxu1 %v1061_v54  ;;  %1295 = vmatprep.subr.mxu0 %v1056_v55  ;;  %v1431_v50 = vsub.s32 0, %v1430_v48  ;;  %v1435_v55 = vsub.s32 1, %v1430_v48 }
 0x2a1   : > { %1366 = vmatprep.subr.mxu1 %v1058_v56  ;;  %1296 = vmatpush1.msra.mxu0 %v1055_v57 }
 0x2a2   : > { %1367 = vmatpush1.msra.mxu1 %v1057_v58  ;;  %1297 = vmatprep.subr.mxu0 %v1052_v59 }
 0x2a3   : > { %1368 = vmatprep.subr.mxu1 %v1054_v60  ;;  %1298 = vmatpush1.msra.mxu0 %v1051_v61 }
 0x2a4   : > { %1369 = vmatpush1.msra.mxu1 %v1053_v62  ;;  %1299 = vmatprep.subr.mxu0 %v1048_v63 }
 0x2a5   : > { %1370 = vmatprep.subr.mxu1 %v1050_v0  ;;  %1300 = vmatpush1.msra.mxu0 %v1047_v1 }
 0x2a6   : > { %1371 = vmatpush1.msra.mxu1 %v1049_v2  ;;  %1301 = vmatprep.subr.mxu0 %v1044_v3 }
 0x2a7   : > { %1372 = vmatprep.subr.mxu1 %v1046_v4  ;;  %1302 = vmatpush1.msra.mxu0 %v1043_v5  ;;  %v1443_v4 = vsub.s32 3, %v1430_v48 }
 0x2a8   : > { %1373 = vmatpush1.msra.mxu1 %v1045_v6  ;;  %1303 = vmatprep.subr.mxu0 %v1040_v7  ;;  %v1439_v6 = vsub.s32 2, %v1430_v48 }
 0x2a9   : > { %1374 = vmatprep.subr.mxu1 %v1042_v9  ;;  %1304 = vmatpush1.msra.mxu0 %v1039_v14 }
 0x2aa   : > { %1375 = vmatpush1.msra.mxu1 %v1041_v15  ;;  %1305 = vmatprep.subr.mxu0 %v1036_v16 }
 0x2ab   : > { %1376 = vmatprep.subr.mxu1 %v1038_v17  ;;  %1306 = vmatpush1.msra.mxu0 %v1035_v18 }
 0x2ac   : > { %1377 = vmatpush1.msra.mxu1 %v1037_v11  ;;  %1307 = vmatprep.subr.mxu0 %v1032_v8 }
 0x2ad   : > { %1378 = vmatprep.subr.mxu1 %v1034_v13  ;;  %1308 = vmatpush1.msra.mxu0 %v1031_v19 }
 0x2ae   : > { %1379 = vmatpush1.msra.mxu1 %v1033_v20  ;;  %1309 = vmatprep.subr.mxu0 %v1028_v21 }
 0x2af   : > { %1380 = vmatprep.subr.mxu1 %v1030_v22  ;;  %1310 = vmatpush1.msra.mxu0 %v1027_v23 }
 0x2b0   : > { %1381 = vmatpush1.msra.mxu1 %v1029_v24  ;;  %1311 = vmatprep.subr.mxu0 %v1024_v25 }
 0x2b1   : > { %1382 = vmatprep.subr.mxu1 %v1026_v26  ;;  %1312 = vmatpush1.msra.mxu0 %v1023_v10 }
 0x2b2   : > { %1383 = vmatpush1.msra.mxu1 %v1025_v12  ;;  %1313 = vmatprep.subr.mxu0 %v1020_v27 }
 0x2b3   : > { %1384 = vmatprep.subr.mxu1 %v1022_v28  ;;  %1314 = vmatpush1.msra.mxu0 %v1019_v29 }
 0x2b4   : > { %1385 = vmatpush1.msra.mxu1 %v1021_v30  ;;  %1315 = vmatprep.subr.mxu0 %v1016_v31 }
 0x2b5   : > { %1386 = vmatprep.subr.mxu1 %v1018_v33  ;;  %1316 = vmatpush1.msra.mxu0 %v1015_v35 }
 0x2b6   : > { %1349 = vmatprep.mubr.f32.mxu0 %v2078_v34  ;;  %1387 = vmatpush1.msra.mxu1 %v1017_v36 }
 0x2b7   : > { %1420 = vmatprep.mubr.f32.mxu1 %v2078_v34  ;;  %v1427_v34 = vld [vmem:[%s2494_s10] sm:$0xf] }
 0x2b8   : > { %v1432_v52 = vrot.slane %v1427_v34, %v1431_v50  ;;  %v1436_v60 = vrot.slane %v1427_v34, %v1435_v55  ;;  %v1444_v14 = vrot.slane %v1427_v34, %v1443_v4  ;;  %v1440_v16 = vrot.slane %v1427_v34, %v1439_v6 }
 0x304   : > { %v1000_v37 = vpop.permute.xlu0 %999 }
 0x305   : > { %v1002_v39 = vmul.f32 %v1000_v37, %v996_v38 }
 0x308   : > { %v1006_v40 = vpop.permute.xlu0 %1005 }
 0x309   : > { %vm1007_vm6 = vcmp.eq.s32.totalorder %v1006_v40, 1 }
 0x30a   : > { %v1008_v41 = vsel %vm1007_vm6, %v1002_v39, 0.0 }
 0x30b   : > { %v1010_v42 = vmin.f32 %v1008_v41, 0.0  ;;  %vm1009_vm7 = vcmp.gt.f32.partialorder %v1008_v41, 0.0 }
 0x30d   : > { %v1011_v43 = vmul.f32 1.442695, %v1010_v42 }
 0x30f   : > { %1874 = vpow2.f32 %v1011_v43 }
 0x31c   : > { %v1875_v44 = vpop.eup %1874 }
 0x31d   : > { %v1655_v45 = vadd.f32 -1.0, %v1875_v44 }
 0x31f   : > { %v1014_v46 = vsel %vm1009_vm7, %v1008_v41, %v1655_v45 }
 0x320   : > { %1350 = vmatmul.mubr.f32.vlgmr.msra.gmra.mxu0 %v1014_v46  ;;  %1421 = vmatmul.mubr.f32.vlgmr.msra.gmra.mxu1 %v1014_v46 }
 0x354   : > { %v1209_v49 = vpop.f32.mrf.mxu0 }
 0x356   : > { %v1211_v51 = vpop.f32.mrf.mxu0 }
 0x357   : > { %v1280_v63 = vpop.f32.mrf.mxu1 }
 0x359   : > { %v1282_v1 = vpop.f32.mrf.mxu1 }
 0x3e0   : > { %v1351_v53 = vpop.f32.mrf.mxu0  ;;  %v1422_v3 = vpop.f32.mrf.mxu1 }
 0x3e1   : > { %v1352_v54 = vadd.f32 %v1351_v53, %v1209_v49  ;;  %v1423_v15 = vadd.f32 %v1422_v3, %v1280_v63 }
 0x3e2   : > { %v1353_v56 = vpop.f32.mrf.mxu0  ;;  %v1424_v5 = vpop.f32.mrf.mxu1 }
 0x3e3   : > { %v1449_v57 = vadd.f32 %v1432_v52, %v1352_v54  ;;  %v1354_v59 = vadd.f32 %v1353_v56, %v1211_v51  ;;  %v1425_v9 = vadd.f32 %v1424_v5, %v1282_v1  ;;  %v1451_v8 = vadd.f32 %v1440_v16, %v1423_v15 }
 0x3e5   : > { %v1656_v58 = vmul.f32 -1.442695, %v1449_v57  ;;  %v1450_v61 = vadd.f32 %v1436_v60, %v1354_v59  ;;  %v1452_v18 = vadd.f32 %v1444_v14, %v1425_v9 }
 0x3e7   : > { %1876 = vpow2.f32 %v1656_v58  ;;  %v1657_v62 = vmul.f32 -1.442695, %v1450_v61 }
 0x3e9   : > { %1878 = vpow2.f32 %v1657_v62 }
 0x3f4   : > { %v1877_v0 = vpop.eup %1876 }
 0x3f5   : > { %v1456_v2 = vadd.f32 1.0, %v1877_v0 }
 0x3f6   : > { %v1879_v7 = vpop.eup %1878 }
 0x3f7   : > { %1880 = vrcp.f32 %v1456_v2  ;;  %v1462_v17 = vadd.f32 1.0, %v1879_v7 }
 0x3f9   : > { %1882 = vrcp.f32 %v1462_v17 }
 0x404   : > { %v1881_v11 = vpop.eup %1880 }
 0x405   : > { %v1465_v13 = vmul.f32 %v1881_v11, %v1452_v18 }
 0x406   : > { %v1883_v20 = vpop.eup %1882 }
 0x407   : > { %v1466_v19 = vadd.f32 %v1465_v13, %v1451_v8  ;;  %v1468_v21 = vsub.f32 1.0, %v1883_v20  ;;  %v1470_v23 = vmul.f32 %v1883_v20, %v2423_v32 }
 0x409   : > { %1884 = vtanh.f32 %v1466_v19 }
 0x416   : > { %v1885_v22 = vpop.eup %1884 }
 0x417   : > { %v1469_v24 = vmul.f32 %v1885_v22, %v1468_v21 }
 0x419   : > { %v1471_v25 = vadd.f32 %v1470_v23, %v1469_v24 }
 0x41b   : > { %v1472_v26 = vmax.f32 %v1471_v25, 0.0 }
 0x41d   : > { %1473 = vst [vmem:[%s550_s24] sm:$0xff] %v1472_v26 }
 0x41e PF: > { %s1659_s14 = sshll.u32 %s2052_s29, 7  ;;  %s1488_s16 = sshll.u32 %s550_s24, 4  ;;  %s1489_s16 = int_to_ptr.vmem [resolvable:$true] %s1488_s16 }
 0x41f   : > { %s1486_s27 = scalar_lea.hbm %s2495_s11, %s1659_s14  ;;  %s2525_s13 = sand.u32 1, %s2040_s26  }
 0x420   : > { %s1475_s1 = scalar_lea.sflag [#allocation10], %s2525_s13  ;;  %s1962_s17 = scalar_lea.vmem %s1489_s16, 128 }
 0x421   : > { %p1963_p9 = scmp.ne.s32.totalorder %s1489_s16, %s1962_s17  ;;  %s2079_s21 = smov [#allocation13]  }
 0x422   : > { %s1966_s15 = sshll.u32 %s2079_s21, 4  ;;  %s1967_s15 = int_to_ptr.vmem [resolvable:$false] %s1966_s15 }
 0x423   : > { %p1964_p10 = pnand %p1963_p9, %p2196_p13  ;;  %s1968_s22 = scalar_lea.vmem %s1967_s15, 256 }
 0x424   : > { %p1969_p7 = scmp.lt.s32.totalorder %s1489_s16, %s1967_s15  ;;  %p1970_p8 = scmp.lt.s32.totalorder %s1968_s22, %s1962_s17 }
 0x425   : > { %p1965_p11 = pneg %p1964_p10 }
 0x426   : > { %p1971_p12 = por %p1970_p8, %p1969_p7 }
 0x428   : > { %p1972_p0 = pnand %p1971_p12, %p1965_p11 }
 0x42a   : > { %1975 = shalt.err (!%p1972_p0)
}
 0x42b   : > { %s1976_s29 = scalar_lea.hbm %s1486_s27, 128  ;;  %s1980_s30 = scalar_lea.hbm %s2495_s11, 256 }
 0x42c   : > { %p1977_p1 = scmp.ne.s32.totalorder %s1486_s27, %s1976_s29  ;;  %p1981_p4 = scmp.lt.s32.totalorder %s1486_s27, %s2495_s11 }
 0x42d   : > { %p1982_p6 = scmp.lt.s32.totalorder %s1980_s30, %s1976_s29 }
 0x42e   : > { %p1978_p2 = pnand %p1977_p1, %p2196_p13 }
 0x42f   : > { %p1983_p9 = por %p1982_p6, %p1981_p4 }
 0x430   : > { %p1979_p3 = pneg %p1978_p2 }
 0x432   : > { %p1984_p10 = pnand %p1983_p9, %p1979_p3 }
 0x434   : > { %1987 = shalt.err (!%p1984_p10)
}
 0x435   : > { %1768 = dma.vmem_to_hbm [thread:$0]  (%p2196_p13), %s1489_s16, 128, %s1486_s27, %s1475_s1  }
 0x436 PF: > { %s2526_s0 = sld [smem:[#allocation22_spill]] }
 0x437   : > { %s2527_s25 = sld [smem:[#allocation18_spill]] }
 0x43c   : > { %p1785_p11 = scmp.ge.s32.totalorder %s2526_s0, 2 }
 0x43d   : > { %s1500_s20 = sand.u32 1, %s2527_s25  }
 0x43e   : > { %p1778_p7 = pnand %p1785_p11, %p2206_p5  ;;  %s1501_s14 = scalar_lea.sflag [#allocation10], %s1500_s20 }
 0x440   : > { %p1779_p8 = pneg %p1778_p7 }
 0x442   : > { %2031 = dma.done.wait (%p1779_p8), %s1501_s14, 128  }
 0x443   : > { %2033 = vsyncadd (%p1779_p8), %s1501_s14, 4294967168  ;;  %s36_s13 = sadd.s32 1, %s2526_s0   ;;  %s2529_s23 = sld [smem:[#allocation19_spill]] }
 0x444   : > { %p33_p12 = scmp.ge.s32.totalorder %s36_s13, 8   ;;  %s2530_s27 = sld [smem:[#allocation26_spill]] }
 0x445   : > { %s2531_s28 = sld [smem:[#allocation20_spill]]  ;;  %s2535_s1 = smov %s2040_s26 }
 0x446   : > { %s2532_s29 = sld [smem:[#allocation21_spill]]  ;;  %35 = sbr.rel (!%p33_p12) target bundleno = 33 (0x21), region = 121 }
 0x447   : > { %s2533_s30 = sld [smem:[#allocation23_spill]] }
 0x448   : > { %s2534_s12 = sld [smem:[#allocation24_spill]] }
 0x449   : > { %s2536_s26 = smov %s2529_s23 }
 0x44b   :  { %1506 = vsyncpa [#allocation9], 1 }
 0x44c   :  { %1508 = vsyncpa [#allocation9 + $0x1], 1 }
 0x44d   :  { %1509 = vsyncpa [#allocation12], 1 }
 0x44e   :  { %1510 = vsyncpa [#allocation10], 1 }
 0x44f   :  { %1512 = vsyncpa [#allocation10 + $0x1], 1 }

</bundles_post_ra>
